<compile_context>
chip_gen: v7x
topology: tpu7x:2x2x1
jax: 0.10.0
libtpu: 0.0.40
codegen_flags: <defaults>
</compile_context>

<pallas_src>
import jax
import jax.numpy as jnp
import numpy as np
from jax import lax
from jax import image as jimage
from jax.experimental import pallas as pl
from jax.experimental.pallas import tpu as pltpu


def _round_up(v, m):
    return (v + m - 1) // m * m


def bn_fold(gamma, beta, mean, var, eps=1e-5):
    """Fold eval-mode BatchNorm2d into per-channel scale/bias."""
    scale = gamma / jnp.sqrt(var + eps)
    return scale, beta - mean * scale


# ----------------------------------------------------------------------------
# Fused Pallas kernel:  relu( upsample2x_bilinear( x @ W * scale + bias ) )
# ----------------------------------------------------------------------------
def _interp_conv_kernel(x_ref, w_ref, s_ref, b_ref, o_ref):
    # x_ref: (H*W, Cin)   bf16   one batch image, spatially flattened
    # w_ref: (Cin, Cp)    bf16   1x1 conv weight, Cout zero-padded to Cp
    # s_ref, b_ref: (1, Cp) f32  folded BatchNorm scale / bias
    # o_ref: (H, 2, W, 2*Cp)     (row-parity, col-parity)-packed output
    H, _, W, two_cp = o_ref.shape
    cp = two_cp // 2

    # 1x1 conv (MXU, f32 accumulation) + BN affine epilogue.
    z = jnp.dot(x_ref[...], w_ref[...], preferred_element_type=jnp.float32)
    z = z * s_ref[...] + b_ref[...]
    z = z.reshape(H, W, cp)

    # Bilinear 2x, align_corners=False:
    #   out[2h]   = 0.25*z[h-1] + 0.75*z[h]   (h-1 clamped at the top edge)
    #   out[2h+1] = 0.75*z[h]   + 0.25*z[h+1] (h+1 clamped at the bottom edge)
    z_up = jnp.concatenate([z[:1], z[:-1]], axis=0)
    z_dn = jnp.concatenate([z[1:], z[-1:]], axis=0)
    r_even = 0.25 * z_up + 0.75 * z
    r_odd = 0.75 * z + 0.25 * z_dn

    def col_blend(r):
        # Same blend along W; pack [even-col | odd-col] along the lane dim.
        left = jnp.concatenate([r[:, :1, :], r[:, :-1, :]], axis=1)
        right = jnp.concatenate([r[:, 1:, :], r[:, -1:, :]], axis=1)
        even = 0.25 * left + 0.75 * r
        odd = 0.75 * r + 0.25 * right
        return jnp.concatenate([even, odd], axis=-1)  # (H, W, 2*Cp)

    o_ref[:, 0, :, :] = jnp.maximum(col_blend(r_even), 0.0).astype(o_ref.dtype)
    o_ref[:, 1, :, :] = jnp.maximum(col_blend(r_odd), 0.0).astype(o_ref.dtype)


# ----------------------------------------------------------------------------
# Wrapper (layout plumbing only; all compute is inside the Pallas kernel)
# ----------------------------------------------------------------------------
def interp_conv_forward(x_nhwc, w_io, gamma, beta, mean, var, eps=1e-5,
                        out_dtype=jnp.float32):
    """InterpConv forward: bilinear 2x -> 1x1 conv -> BN(eval) -> ReLU.

    x_nhwc: (N, H, W, Cin) f32;  w_io: (Cin, Cout) 1x1 conv weight.
    Returns (N, 2H, 2W, Cout).
    """
    N, H, W, Cin = x_nhwc.shape
    Cout = w_io.shape[1]
    scale, bias = bn_fold(gamma, beta, mean, var, eps)

    # Lane-dense output: pad Cout up to a multiple of 128 with zero columns.
    cp = _round_up(Cout, 128)
    if cp != Cout:
        w_io = jnp.pad(w_io, ((0, 0), (0, cp - Cout)))
        scale = jnp.pad(scale, (0, cp - Cout))
        bias = jnp.pad(bias, (0, cp - Cout))

    # bf16 GEMM operands (MXU native); accumulation stays f32 in-kernel.
    x2d = x_nhwc.reshape(N, H * W, Cin).astype(jnp.bfloat16)
    w_bf = w_io.astype(jnp.bfloat16)
    s2d = scale.reshape(1, cp).astype(jnp.float32)
    b2d = bias.reshape(1, cp).astype(jnp.float32)

    out5 = pl.pallas_call(
        _interp_conv_kernel,
        out_shape=jax.ShapeDtypeStruct((N, H, 2, W, 2 * cp), out_dtype),
        grid_spec=pltpu.PrefetchScalarGridSpec(
            num_scalar_prefetch=0,
            grid=(N,),
            in_specs=[
                pl.BlockSpec((None, H * W, Cin), lambda n: (n, 0, 0)),
                pl.BlockSpec((Cin, cp), lambda n: (0, 0)),
                pl.BlockSpec((1, cp), lambda n: (0, 0)),
                pl.BlockSpec((1, cp), lambda n: (0, 0)),
            ],
            out_specs=pl.BlockSpec((None, H, 2, W, 2 * cp),
                                   lambda n: (n, 0, 0, 0, 0)),
        ),
        compiler_params=pltpu.CompilerParams(
            dimension_semantics=("parallel",)),
    )(x2d, w_bf, s2d, b2d)

    # (N, H, 2, W, 2, Cp) row-major == (N, 2H, 2W, Cp): contiguous (free) reshape.
    out = out5.reshape(N, 2 * H, 2 * W, cp)
    return out[..., :Cout] if cp != Cout else out


# ----------------------------------------------------------------------------
# Independent pure-JAX reference: original op order (upsample -> conv -> BN ->
# ReLU) with jax.image.resize providing the align_corners=False semantics.
# ----------------------------------------------------------------------------
def ref_interp_conv(x_nhwc, w_io, gamma, beta, mean, var, eps=1e-5):
    N, H, W, Cin = x_nhwc.shape
    up = jimage.resize(x_nhwc, (N, 2 * H, 2 * W, Cin), method="bilinear",
                       antialias=False, precision=lax.Precision.HIGHEST)
    y = jnp.einsum("nhwc,cd->nhwd", up, w_io, precision=lax.Precision.HIGHEST)
    s, b = bn_fold(gamma, beta, mean, var, eps)
    return jnp.maximum(y * s + b, 0.0)


if __name__ == "__main__":
    key = jax.random.PRNGKey(0)
    k_x, k_w, k_g, k_b, k_m, k_v = jax.random.split(key, 6)

    N, Cin, Cout = 2, 8, 4
    H = W = 16

    # PyTorch-convention NCHW input and OIHW 1x1 conv weight (bias=False).
    x_nchw = jax.random.normal(k_x, (N, Cin, H, W), jnp.float32)
    w_oihw = jax.random.normal(k_w, (Cout, Cin, 1, 1), jnp.float32) * 0.2

    # BatchNorm2d (eval mode) parameters.
    gamma = jax.random.uniform(k_g, (Cout,), jnp.float32, 0.5, 1.5)
    beta = jax.random.normal(k_b, (Cout,), jnp.float32) * 0.1
    mean = jax.random.normal(k_m, (Cout,), jnp.float32) * 0.1
    var = jax.random.uniform(k_v, (Cout,), jnp.float32, 0.5, 1.5)

    # NCHW -> NHWC and OIHW -> (Cin, Cout) at the wrapper boundary.
    x_nhwc = jnp.transpose(x_nchw, (0, 2, 3, 1))
    w_io = jnp.transpose(w_oihw[:, :, 0, 0], (1, 0))

    out_nhwc = interp_conv_forward(x_nhwc, w_io, gamma, beta, mean, var)
    out_nchw = jax.block_until_ready(jnp.transpose(out_nhwc, (0, 3, 1, 2)))
    assert out_nchw.shape == (N, Cout, 2 * H, 2 * W)

    # Reference uses the same bf16-quantized operands so the comparison
    # isolates the kernel's structure (order of ops, upsample semantics).
    xq = x_nhwc.astype(jnp.bfloat16).astype(jnp.float32)
    wq = w_io.astype(jnp.bfloat16).astype(jnp.float32)
    ref_nhwc = ref_interp_conv(xq, wq, gamma, beta, mean, var)
    ref_nchw = jax.block_until_ready(jnp.transpose(ref_nhwc, (0, 3, 1, 2)))

    np.testing.assert_allclose(np.asarray(out_nchw), np.asarray(ref_nchw),
                               rtol=1e-4, atol=1e-4)
    print("KERNEL_OK")
</pallas_src>

<mosaic_0001>
module attributes {stable_mosaic.version = 11 : i64} {
  func.func @_interp_conv_kernel(%arg0: i32, %arg1: memref<1x256x8xbf16, #tpu.memory_space<vmem>>, %arg2: memref<8x128xbf16, #tpu.memory_space<vmem>>, %arg3: memref<1x128xf32, #tpu.memory_space<vmem>>, %arg4: memref<1x128xf32, #tpu.memory_space<vmem>>, %arg5: memref<1x16x2x16x256xf32, #tpu.memory_space<vmem>>) attributes {dimension_semantics = [#tpu.dimension_semantics<parallel>], iteration_bounds = array<i64: 2>, scalar_prefetch = 0 : i64, scratch_operands = 0 : i64, tpu.core_type = #tpu.core_type<tc>, window_params = [{transform_indices = @transform_0, window_bounds = array<i64: 1, 256, 8>}, {pipeline_mode = #tpu.pipeline_mode<synchronous>, transform_indices = @transform_1, window_bounds = array<i64: 8, 128>}, {pipeline_mode = #tpu.pipeline_mode<synchronous>, transform_indices = @transform_2, window_bounds = array<i64: 1, 128>}, {pipeline_mode = #tpu.pipeline_mode<synchronous>, transform_indices = @transform_3, window_bounds = array<i64: 1, 128>}, {transform_indices = @transform_4, window_bounds = array<i64: 1, 16, 2, 16, 256>}]} {
    %c0 = arith.constant 0 : index
    %c0_0 = arith.constant 0 : index
    %c0_1 = arith.constant 0 : index
    %0 = vector.load %arg1[%c0, %c0_0, %c0_1] : memref<1x256x8xbf16, #tpu.memory_space<vmem>>, vector<1x256x8xbf16>
    %1 = vector.shape_cast %0 : vector<1x256x8xbf16> to vector<256x8xbf16>
    %c0_2 = arith.constant 0 : index
    %c0_3 = arith.constant 0 : index
    %2 = vector.load %arg2[%c0_2, %c0_3] : memref<8x128xbf16, #tpu.memory_space<vmem>>, vector<8x128xbf16>
    %cst = arith.constant dense<0.000000e+00> : vector<256x128xf32>
    %3 = tpu.matmul %1, %2, %cst {dimension_numbers = #tpu.dot_dimension_numbers<[1], [0], [0], [1], [0, 0, 1, 1], [], []>} : vector<256x8xbf16>, vector<8x128xbf16>, vector<256x128xf32> -> vector<256x128xf32>
    %c0_4 = arith.constant 0 : index
    %c0_5 = arith.constant 0 : index
    %4 = vector.load %arg3[%c0_4, %c0_5] : memref<1x128xf32, #tpu.memory_space<vmem>>, vector<1x128xf32>
    %5 = vector.broadcast %4 : vector<1x128xf32> to vector<256x128xf32>
    %6 = arith.mulf %3, %5 : vector<256x128xf32>
    %c0_6 = arith.constant 0 : index
    %c0_7 = arith.constant 0 : index
    %7 = vector.load %arg4[%c0_6, %c0_7] : memref<1x128xf32, #tpu.memory_space<vmem>>, vector<1x128xf32>
    %8 = vector.broadcast %7 : vector<1x128xf32> to vector<256x128xf32>
    %9 = arith.addf %6, %8 : vector<256x128xf32>
    %10 = vector.shape_cast %9 : vector<256x128xf32> to vector<16x16x128xf32>
    %11 = vector.extract_strided_slice %10 {offsets = [0, 0, 0], sizes = [1, 16, 128], strides = [1, 1, 1]} : vector<16x16x128xf32> to vector<1x16x128xf32>
    %12 = vector.extract_strided_slice %10 {offsets = [0, 0, 0], sizes = [15, 16, 128], strides = [1, 1, 1]} : vector<16x16x128xf32> to vector<15x16x128xf32>
    %13 = tpu.concatenate %11, %12 in 0 : vector<1x16x128xf32>, vector<15x16x128xf32> -> vector<16x16x128xf32>
    %14 = vector.extract_strided_slice %10 {offsets = [1, 0, 0], sizes = [15, 16, 128], strides = [1, 1, 1]} : vector<16x16x128xf32> to vector<15x16x128xf32>
    %15 = vector.extract_strided_slice %10 {offsets = [15, 0, 0], sizes = [1, 16, 128], strides = [1, 1, 1]} : vector<16x16x128xf32> to vector<1x16x128xf32>
    %16 = tpu.concatenate %14, %15 in 0 : vector<15x16x128xf32>, vector<1x16x128xf32> -> vector<16x16x128xf32>
    %cst_8 = arith.constant 2.500000e-01 : f32
    %17 = vector.broadcast %cst_8 : f32 to vector<16x16x128xf32>
    %18 = arith.mulf %17, %13 : vector<16x16x128xf32>
    %cst_9 = arith.constant 7.500000e-01 : f32
    %19 = vector.broadcast %cst_9 : f32 to vector<16x16x128xf32>
    %20 = arith.mulf %19, %10 : vector<16x16x128xf32>
    %21 = arith.addf %18, %20 : vector<16x16x128xf32>
    %cst_10 = arith.constant 7.500000e-01 : f32
    %22 = vector.broadcast %cst_10 : f32 to vector<16x16x128xf32>
    %23 = arith.mulf %22, %10 : vector<16x16x128xf32>
    %cst_11 = arith.constant 2.500000e-01 : f32
    %24 = vector.broadcast %cst_11 : f32 to vector<16x16x128xf32>
    %25 = arith.mulf %24, %16 : vector<16x16x128xf32>
    %26 = arith.addf %23, %25 : vector<16x16x128xf32>
    %27 = vector.extract_strided_slice %21 {offsets = [0, 0, 0], sizes = [16, 1, 128], strides = [1, 1, 1]} : vector<16x16x128xf32> to vector<16x1x128xf32>
    %28 = vector.extract_strided_slice %21 {offsets = [0, 0, 0], sizes = [16, 15, 128], strides = [1, 1, 1]} : vector<16x16x128xf32> to vector<16x15x128xf32>
    %29 = tpu.concatenate %27, %28 in 1 : vector<16x1x128xf32>, vector<16x15x128xf32> -> vector<16x16x128xf32>
    %30 = vector.extract_strided_slice %21 {offsets = [0, 1, 0], sizes = [16, 15, 128], strides = [1, 1, 1]} : vector<16x16x128xf32> to vector<16x15x128xf32>
    %31 = vector.extract_strided_slice %21 {offsets = [0, 15, 0], sizes = [16, 1, 128], strides = [1, 1, 1]} : vector<16x16x128xf32> to vector<16x1x128xf32>
    %32 = tpu.concatenate %30, %31 in 1 : vector<16x15x128xf32>, vector<16x1x128xf32> -> vector<16x16x128xf32>
    %cst_12 = arith.constant 2.500000e-01 : f32
    %33 = vector.broadcast %cst_12 : f32 to vector<16x16x128xf32>
    %34 = arith.mulf %33, %29 : vector<16x16x128xf32>
    %cst_13 = arith.constant 7.500000e-01 : f32
    %35 = vector.broadcast %cst_13 : f32 to vector<16x16x128xf32>
    %36 = arith.mulf %35, %21 : vector<16x16x128xf32>
    %37 = arith.addf %34, %36 : vector<16x16x128xf32>
    %cst_14 = arith.constant 7.500000e-01 : f32
    %38 = vector.broadcast %cst_14 : f32 to vector<16x16x128xf32>
    %39 = arith.mulf %38, %21 : vector<16x16x128xf32>
    %cst_15 = arith.constant 2.500000e-01 : f32
    %40 = vector.broadcast %cst_15 : f32 to vector<16x16x128xf32>
    %41 = arith.mulf %40, %32 : vector<16x16x128xf32>
    %42 = arith.addf %39, %41 : vector<16x16x128xf32>
    %43 = tpu.concatenate %37, %42 in 2 : vector<16x16x128xf32>, vector<16x16x128xf32> -> vector<16x16x256xf32>
    %cst_16 = arith.constant 0.000000e+00 : f32
    %44 = vector.broadcast %cst_16 : f32 to vector<16x16x256xf32>
    %45 = arith.maximumf %43, %44 : vector<16x16x256xf32>
    %c0_17 = arith.constant 0 : index
    %c0_18 = arith.constant 0 : index
    %c0_19 = arith.constant 0 : index
    %c0_20 = arith.constant 0 : index
    %c0_21 = arith.constant 0 : index
    %46 = vector.load %arg5[%c0_17, %c0_18, %c0_19, %c0_20, %c0_21] : memref<1x16x2x16x256xf32, #tpu.memory_space<vmem>>, vector<1x16x1x16x256xf32>
    %47 = vector.shape_cast %46 : vector<1x16x1x16x256xf32> to vector<16x16x256xf32>
    %48 = vector.shape_cast %45 : vector<16x16x256xf32> to vector<1x16x1x16x256xf32>
    tpu.vector_store %arg5[%c0_17, %c0_18, %c0_19, %c0_20, %c0_21], %48 {strides = array<i32>} : memref<1x16x2x16x256xf32, #tpu.memory_space<vmem>>, vector<1x16x1x16x256xf32>,
    %49 = vector.extract_strided_slice %26 {offsets = [0, 0, 0], sizes = [16, 1, 128], strides = [1, 1, 1]} : vector<16x16x128xf32> to vector<16x1x128xf32>
    %50 = vector.extract_strided_slice %26 {offsets = [0, 0, 0], sizes = [16, 15, 128], strides = [1, 1, 1]} : vector<16x16x128xf32> to vector<16x15x128xf32>
    %51 = tpu.concatenate %49, %50 in 1 : vector<16x1x128xf32>, vector<16x15x128xf32> -> vector<16x16x128xf32>
    %52 = vector.extract_strided_slice %26 {offsets = [0, 1, 0], sizes = [16, 15, 128], strides = [1, 1, 1]} : vector<16x16x128xf32> to vector<16x15x128xf32>
    %53 = vector.extract_strided_slice %26 {offsets = [0, 15, 0], sizes = [16, 1, 128], strides = [1, 1, 1]} : vector<16x16x128xf32> to vector<16x1x128xf32>
    %54 = tpu.concatenate %52, %53 in 1 : vector<16x15x128xf32>, vector<16x1x128xf32> -> vector<16x16x128xf32>
    %cst_22 = arith.constant 2.500000e-01 : f32
    %55 = vector.broadcast %cst_22 : f32 to vector<16x16x128xf32>
    %56 = arith.mulf %55, %51 : vector<16x16x128xf32>
    %cst_23 = arith.constant 7.500000e-01 : f32
    %57 = vector.broadcast %cst_23 : f32 to vector<16x16x128xf32>
    %58 = arith.mulf %57, %26 : vector<16x16x128xf32>
    %59 = arith.addf %56, %58 : vector<16x16x128xf32>
    %cst_24 = arith.constant 7.500000e-01 : f32
    %60 = vector.broadcast %cst_24 : f32 to vector<16x16x128xf32>
    %61 = arith.mulf %60, %26 : vector<16x16x128xf32>
    %cst_25 = arith.constant 2.500000e-01 : f32
    %62 = vector.broadcast %cst_25 : f32 to vector<16x16x128xf32>
    %63 = arith.mulf %62, %54 : vector<16x16x128xf32>
    %64 = arith.addf %61, %63 : vector<16x16x128xf32>
    %65 = tpu.concatenate %59, %64 in 2 : vector<16x16x128xf32>, vector<16x16x128xf32> -> vector<16x16x256xf32>
    %cst_26 = arith.constant 0.000000e+00 : f32
    %66 = vector.broadcast %cst_26 : f32 to vector<16x16x256xf32>
    %67 = arith.maximumf %65, %66 : vector<16x16x256xf32>
    %c0_27 = arith.constant 0 : index
    %c0_28 = arith.constant 0 : index
    %c1 = arith.constant 1 : index
    %c0_29 = arith.constant 0 : index
    %c0_30 = arith.constant 0 : index
    %68 = vector.load %arg5[%c0_27, %c0_28, %c1, %c0_29, %c0_30] : memref<1x16x2x16x256xf32, #tpu.memory_space<vmem>>, vector<1x16x1x16x256xf32>
    %69 = vector.shape_cast %68 : vector<1x16x1x16x256xf32> to vector<16x16x256xf32>
    %70 = vector.shape_cast %67 : vector<16x16x256xf32> to vector<1x16x1x16x256xf32>
    tpu.vector_store %arg5[%c0_27, %c0_28, %c1, %c0_29, %c0_30], %70 {strides = array<i32>} : memref<1x16x2x16x256xf32, #tpu.memory_space<vmem>>, vector<1x16x1x16x256xf32>,
    return
  }
  func.func @transform_0(%arg0: i32) -> (i32, i32, i32) {
    %c0_i32 = arith.constant 0 : i32
    %c0_i32_0 = arith.constant 0 : i32
    %c0_i32_1 = arith.constant 0 : i32
    return %arg0, %c0_i32, %c0_i32_0 : i32, i32, i32
  }
  func.func @transform_1(%arg0: i32) -> (i32, i32) {
    %c0_i32 = arith.constant 0 : i32
    %c0_i32_0 = arith.constant 0 : i32
    %c0_i32_1 = arith.constant 0 : i32
    return %c0_i32, %c0_i32_0 : i32, i32
  }
  func.func @transform_2(%arg0: i32) -> (i32, i32) {
    %c0_i32 = arith.constant 0 : i32
    %c0_i32_0 = arith.constant 0 : i32
    %c0_i32_1 = arith.constant 0 : i32
    return %c0_i32, %c0_i32_0 : i32, i32
  }
  func.func @transform_3(%arg0: i32) -> (i32, i32) {
    %c0_i32 = arith.constant 0 : i32
    %c0_i32_0 = arith.constant 0 : i32
    %c0_i32_1 = arith.constant 0 : i32
    return %c0_i32, %c0_i32_0 : i32, i32
  }
  func.func @transform_4(%arg0: i32) -> (i32, i32, i32, i32, i32) {
    %c0_i32 = arith.constant 0 : i32
    %c0_i32_0 = arith.constant 0 : i32
    %c0_i32_1 = arith.constant 0 : i32
    %c0_i32_2 = arith.constant 0 : i32
    %c0_i32_3 = arith.constant 0 : i32
    return %arg0, %c0_i32, %c0_i32_0, %c0_i32_1, %c0_i32_2 : i32, i32, i32, i32, i32
  }
}

</mosaic_0001>

<bundles_post_ra>
// kernel: tpu_custom_call.1
= control target key start
LH: loop header
LB: loop body
LE: loop exit
PB: predicated region body
PF: predicated region fallthrough
CT: control target
= control target key end

     0   :  { %9 = vsyncpa [#allocation3], 0  ;;  %s3404_s0 = inlined_call_operand.vmem [shape: bf16[2,256,8], index: 0, kind: input, shape index: {}]   ;;  %s3405_s1 = inlined_call_operand.vmem [shape: bf16[8,128], index: 1, kind: input, shape index: {}]   ;;  %s3406_s2 = inlined_call_operand.vmem [shape: f32[1,128], index: 2, kind: input, shape index: {}]   ;;  %s3407_s3 = inlined_call_operand.vmem [shape: f32[1,128], index: 3, kind: input, shape index: {}]   ;;  %s3408_s4 = inlined_call_operand.hbm [shape: f32[2,16,2,16,256], index: 4, kind: output, shape index: {}]  }
   0x1   :  { %11 = vsyncpa [#allocation3 + $0x1], 0  ;;  %s2151_s15 = smov 0   ;;  %s2153_s16 = smov 0  }
   0x2   :  { %s2155_s17 = smov 0   ;;  %s2157_s18 = smov 0  }
   0x3 LB: > { %s2172_s19 = sadd.s32 4294967295, %s2121_s18   ;;  %s1833_s20 = sadd.s32 4294967294, %s2121_s18   ;;  %s2121_s18 = sphi %s2157_s18, %s3496_s18   ;;  %s2117_s17 = sphi %s2155_s17, %s3495_s17   ;;  %s2113_s16 = sphi %s2153_s16, %s3494_s16   ;;  %s2109_s15 = sphi %s2151_s15, %s3493_s15  }
   0x4   : > { %s2176_s21 = sadd.s32 1, %s2121_s18   ;;  %s113_s22 = sadd.s32 1, %s2117_s17 }
   0x5   : > { %s110_s23 = ssub.s32 %s2121_s18, %s2176_s21  ;;  %p123_p0 = scmp.ne.s32.totalorder %s2117_s17, %s2113_s16 }
   0x6   : > { %p111_p1 = scmp.eq.s32.totalorder %s110_s23, 0  ;;  %p124_p2 = scmp.eq.s32.totalorder %s2172_s19, 1 }
   0x7   : > { %p129_p3 = scmp.ne.s32.totalorder %s2113_s16, %s2109_s15  ;;  %p130_p4 = scmp.eq.s32.totalorder %s1833_s20, 1 }
   0x8   : > { %s2187_s24 = scalar_select %p111_p1, %s2117_s17, %s113_s22  }
   0x9   : > { %p2189_p5 = por %p124_p2, %p123_p0  ;;  %p2193_p6 = por %p130_p4, %p129_p3 }
   0xa   : > { %p1836_p7 = scmp.ge.s32.totalorder %s2121_s18, 1  ;;  %p165_p8 = scmp.lt.s32.totalorder %s2121_s18, 3 }
   0xc   : > { %p166_p9 = pnand %p1836_p7, %p165_p8 }
   0xe   : > { %169 = sbr.rel (%p166_p9) target bundleno = 490 (0x1ea), region = 36 }
  0x15   : > { %v229_v0 = vld [vmem:[%s3405_s1] sm:$0xf]  ;;  %vm359_vm0 = vcmask 1043456   ;;  %p191_p10 = scmp.lt.s32.totalorder %s2172_s19, 1  ;;  %vm310_vm1 = vcmask 64512   ;;  %vm762_vm2 = vcmask 1040384  }
  0x16   : > { %1998 = vmatprep.subr.msk.bf16.mxu0 %vm359_vm0, %v229_v0  ;;  %1999 = vmatprep.subr.msk.bf16.mxu1 %vm359_vm0, %v229_v0  ;;  %v361_v1 = vsel %vm359_vm0, %v229_v0, 0  ;;  %v2244_v18 = vld [vmem:[%s3406_s2] ss:$0 sm:$0xff]  ;;  %s188_s12 = sand.u32 1, %s2113_s16   ;;  %vm859_vm3 = vcmask 1046528   ;;  %s1944_s28 = sshll.u32 %s2172_s19, 14 }
  0x17   : > { %1963 = vmatpush3.bf16.msra.mxu0 %v361_v1  ;;  %1997 = vmatpush3.bf16.msra.mxu1 %v361_v1  ;;  %s192_s29 = scalar_select %p191_p10, %s2172_s19, 1  ;;  %v2249_v20 = vld [vmem:[%s3407_s3] ss:$0 sm:$0xff] }
  0x18   : > { %s2339_s13 = sshll.u32 %s188_s12, 10  ;;  %s3351_s5 = scalar_lea.hbm %s3408_s4, %s1944_s28 }
  0x19   : > { %s1943_s30 = sshll.u32 %s192_s29, 7  ;;  %s2381_s14 = scalar_lea.vmem [#allocation2], %s2339_s13 }
  0x1a   : > { %s2207_s7 = scalar_lea.vmem %s3404_s0, %s1943_s30  ;;  %s1771_s29 = sshll.u32 %s2381_s14, 4  ;;  %s3353_s29 = int_to_ptr.vmem [resolvable:$true] %s1771_s29 }
  0x1b   : > { %v2041_v2 = vld [vmem:[%s2207_s7] sm:$0xff]   ;;  %v2043_v4 = vld [vmem:[%s2207_s7 + $0x8] sm:$0xff]   ;;  %v2045_v6 = vld [vmem:[%s2207_s7 + $0x10] sm:$0xff]   ;;  %s3363_s6 = scalar_lea.sflag [#allocation3], %s188_s12  ;;  %s2123_s8 = smov [#allocation2]  }
  0x1c   : > { %v2042_v3 = vld [vmem:[%s2207_s7 + $0x40] sm:$0xff]   ;;  %1964 = vmatprep.mubr.msk.bf16.mxu0 %vm310_vm1, %v2041_v2  ;;  %v2044_v5 = vld [vmem:[%s2207_s7 + $0x48] sm:$0xff]   ;;  %v2046_v7 = vld [vmem:[%s2207_s7 + $0x50] sm:$0xff]   ;;  %s2063_s9 = sshll.u32 %s2123_s8, 4  ;;  %s2064_s9 = int_to_ptr.vmem [resolvable:$false] %s2063_s9 }
  0x1d   : > { %1980 = vmatprep.mubr.msk.bf16.mxu1 %vm310_vm1, %v2042_v3  ;;  %1965 = vmatmul.mubr.msk.bf16.vlgmr.msra.gmra.mrb[0].mxu0 %vm310_vm1, %v2043_v4  ;;  %v2047_v8 = vld [vmem:[%s2207_s7 + $0x18] sm:$0xff]   ;;  %v2049_v10 = vld [vmem:[%s2207_s7 + $0x20] sm:$0xff]   ;;  %v2051_v12 = vld [vmem:[%s2207_s7 + $0x28] sm:$0xff]   ;;  %s2065_s10 = scalar_lea.vmem %s2064_s9, 32768  ;;  %p2066_p0 = scmp.lt.s32.totalorder %s3353_s29, %s2064_s9 }
  0x1e   : > { %1981 = vmatmul.mubr.msk.bf16.vlgmr.msra.gmra.mrb[0].mxu1 %vm310_vm1, %v2044_v5  ;;  %1968 = vmatprep.mubr.msk.bf16.mxu0 %vm310_vm1, %v2045_v6  ;;  %v2048_v9 = vld [vmem:[%s2207_s7 + $0x58] sm:$0xff]   ;;  %v2050_v11 = vld [vmem:[%s2207_s7 + $0x60] sm:$0xff]   ;;  %v2052_v13 = vld [vmem:[%s2207_s7 + $0x68] sm:$0xff]  }
  0x1f   : > { %1984 = vmatprep.mubr.msk.bf16.mxu1 %vm310_vm1, %v2046_v7  ;;  %v2053_v14 = vld [vmem:[%s2207_s7 + $0x30] sm:$0xff]   ;;  %v2055_v16 = vld [vmem:[%s2207_s7 + $0x38] sm:$0xff]  }
  0x20   : > { %v2054_v15 = vld [vmem:[%s2207_s7 + $0x70] sm:$0xff]   ;;  %v2056_v17 = vld [vmem:[%s2207_s7 + $0x78] sm:$0xff]   ;;  %s2059_s7 = scalar_lea.vmem %s3353_s29, 16384 }
  0x21   : > { %p2060_p11 = scmp.ne.s32.totalorder %s3353_s29, %s2059_s7  ;;  %p2067_p1 = scmp.lt.s32.totalorder %s2065_s10, %s2059_s7 }
  0x23   : > { %p2061_p12 = pnand %p2060_p11, %p2189_p5  ;;  %p2068_p2 = por %p2067_p1, %p2066_p0 }
  0x25   : > { %1969 = vmatmul.mubr.msk.bf16.gmra.mrb[4].mxu0 %vm310_vm1, %v2047_v8  ;;  %p2062_p13 = pneg %p2061_p12 }
  0x26   : > { %1985 = vmatmul.mubr.msk.bf16.gmra.mrb[4].mxu1 %vm310_vm1, %v2048_v9  ;;  %1972 = vmatprep.mubr.msk.bf16.mxu0 %vm310_vm1, %v2049_v10 }
  0x27   : > { %1988 = vmatprep.mubr.msk.bf16.mxu1 %vm310_vm1, %v2050_v11  ;;  %p2069_p3 = pnand %p2068_p2, %p2062_p13 }
  0x2d   : > { %1973 = vmatmul.mubr.msk.bf16.gmra.mrb[8].mxu0 %vm310_vm1, %v2051_v12 }
  0x2e   : > { %1989 = vmatmul.mubr.msk.bf16.gmra.mrb[8].mxu1 %vm310_vm1, %v2052_v13  ;;  %1976 = vmatprep.mubr.msk.bf16.mxu0 %vm310_vm1, %v2053_v14 }
  0x2f   : > { %1992 = vmatprep.mubr.msk.bf16.mxu1 %vm310_vm1, %v2054_v15 }
  0x35   : > { %1977 = vmatmul.mubr.msk.bf16.gmra.mrb[12].mxu0 %vm310_vm1, %v2055_v16 }
  0x36   : > { %1993 = vmatmul.mubr.msk.bf16.gmra.mrb[12].mxu1 %vm310_vm1, %v2056_v17 }
  0xf0   : > { %v1966_v19 = vpop.f32.mrb[0].mxu0 }
  0xf1   : > { %v533_v21 = vmul.f32 %v1966_v19, %v2244_v18  ;;  %v1982_v22 = vpop.f32.mrb[0].mxu1  ;;  %v397_v23 = vpop.f32.mrb[1].mxu0 }
  0xf2   : > { %v549_v24 = vmul.f32 %v1982_v22, %v2244_v18  ;;  %v531_v25 = vmul.f32 %v2244_v18, %v397_v23  ;;  %v461_v26 = vpop.f32.mrb[1].mxu1  ;;  %v1967_v27 = vpop.f32.mrb[2].mxu0 }
  0xf3   : > { %v572_v28 = vadd.f32 %v2249_v20, %v533_v21  ;;  %v547_v29 = vmul.f32 %v2244_v18, %v461_v26  ;;  %v534_v30 = vmul.f32 %v1967_v27, %v2244_v18  ;;  %v1983_v31 = vpop.f32.mrb[2].mxu1  ;;  %v400_v32 = vpop.f32.mrb[3].mxu0 }
  0xf4   : > { %v588_v33 = vadd.f32 %v2249_v20, %v549_v24  ;;  %v570_v34 = vadd.f32 %v2249_v20, %v531_v25  ;;  %v550_v35 = vmul.f32 %v1983_v31, %v2244_v18  ;;  %v532_v36 = vmul.f32 %v2244_v18, %v400_v32  ;;  %v464_v37 = vpop.f32.mrb[3].mxu1 }
  0xf5   : > { %v2261_v38 = vmul.f32 0.25, %v572_v28  ;;  %v2263_v39 = vmul.f32 0.75, %v572_v28  ;;  %v586_v40 = vadd.f32 %v2249_v20, %v547_v29  ;;  %v573_v41 = vadd.f32 %v2249_v20, %v534_v30 }
  0xf6   : > { %v2267_v42 = vmul.f32 0.25, %v588_v33  ;;  %v2269_v43 = vmul.f32 0.75, %v588_v33  ;;  %v602_v44 = vmul.f32 0.25, %v570_v34  ;;  %v632_v45 = vmul.f32 0.75, %v570_v34 }
  0xf7   : > { %v2271_v46 = vmul.f32 0.25, %v586_v40  ;;  %v2273_v47 = vmul.f32 0.75, %v586_v40  ;;  %v2275_v48 = vmul.f32 0.25, %v573_v41  ;;  %v2277_v49 = vmul.f32 0.75, %v573_v41 }
  0xf8   : > { %v2279_v50 = vadd.f32 %v632_v45, %v602_v44  ;;  %v2282_v51 = vadd.f32 %v2263_v39, %v602_v44  ;;  %v2285_v52 = vadd.f32 %v632_v45, %v2261_v38  ;;  %v589_v53 = vadd.f32 %v2249_v20, %v550_v35  ;;  %v1970_v54 = vpop.f32.mrb[4].mxu0 }
  0xf9   : > { %3434 = vst [vmem:[#allocation5_spill] sm:$0xff] %v2271_v46  ;;  %3435 = vst [vmem:[#allocation6_spill] sm:$0xff] %v2273_v47  ;;  %v2291_v55 = vadd.f32 %v2269_v43, %v2271_v46  ;;  %v2295_v56 = vadd.f32 %v2273_v47, %v2267_v42  ;;  %v571_v57 = vadd.f32 %v2249_v20, %v532_v36  ;;  %v2299_v59 = vpop.f32.mrb[4].mxu1  ;;  %v2301_v60 = vpop.f32.mrb[5].mxu0 }
  0xfa   : > { %v548_v58 = vmul.f32 %v2244_v18, %v464_v37  ;;  %v763_v61 = vrot.slane %v2279_v50, 7  ;;  %v766_v62 = vrot.slane %v2282_v51, 7  ;;  %v860_v63 = vrot.slane %v2279_v50, 1  ;;  %v2307_v1 = vpop.f32.mrb[5].mxu1  ;;  %v2309_v2 = vpop.f32.mrb[6].mxu0 }
  0xfb   : > { %v863_v0 = vrot.slane %v2282_v51, 1  ;;  %v2312_v3 = vmul.f32 0.75, %v2279_v50  ;;  %v2315_v4 = vmul.f32 0.75, %v2282_v51  ;;  %v3411_v5 = vrot.slane %v2285_v52, 7  ;;  %v2319_v7 = vpop.f32.mrb[6].mxu1  ;;  %v2321_v8 = vpop.f32.mrb[7].mxu0 }
  0xfc   : > { %v843_v9 = vsel %vm762_vm2, %v2279_v50, %v763_v61  ;;  %v844_v10 = vsel %vm762_vm2, %v2282_v51, %v766_v62  ;;  %v2332_v11 = vmul.f32 0.75, %v2285_v52  ;;  %v3410_v12 = vrot.slane %v2291_v55, 7  ;;  %v2335_v13 = vpop.f32.mrb[7].mxu1 }
  0xfd   : > { %v956_v14 = vmul.f32 0.25, %v843_v9  ;;  %v958_v15 = vmul.f32 0.25, %v844_v10  ;;  %v1356_v16 = vsel %vm762_vm2, %v2285_v52, %v3411_v5  ;;  %v2351_v22 = vmul.f32 0.75, %v2291_v55 }
  0xfe   : > { %v1468_v19 = vmul.f32 0.25, %v1356_v16  ;;  %v852_v21 = vsel %vm762_vm2, %v2291_v55, %v3410_v12  ;;  %v3409_v23 = vrot.slane %v2295_v56, 7  ;;  %v2363_v30 = vmul.f32 0.75, %v2295_v56 }
  0xff   : > { %v1020_v24 = vadd.f32 %v2312_v3, %v956_v14  ;;  %v1022_v25 = vadd.f32 %v2315_v4, %v958_v15  ;;  %v974_v26 = vmul.f32 0.25, %v852_v21  ;;  %v2365_v31 = vmul.f32 0.25, %v589_v53 }
 0x100   : > { %v1532_v28 = vadd.f32 %v2332_v11, %v1468_v19  ;;  %v1364_v29 = vsel %vm762_vm2, %v2295_v56, %v3409_v23  ;;  %v2367_v32 = vpop.f32.mrb[8].mxu0  ;;  %v2374_v44 = vmul.f32 0.75, %v589_v53  ;;  %v603_v45 = vmul.f32 0.25, %v571_v57 }
 0x101   : > { %v1116_v33 = vmax.f32 %v1020_v24, 0.0  ;;  %v1120_v34 = vmax.f32 %v1022_v25, 0.0  ;;  %v1038_v35 = vadd.f32 %v2351_v22, %v974_v26  ;;  %v1484_v36 = vmul.f32 0.25, %v1364_v29  ;;  %v2370_v37 = vpop.f32.mrb[8].mxu1  ;;  %v2372_v40 = vpop.f32.mrb[9].mxu0 }
 0x102   : > { %v1628_v41 = vmax.f32 %v1532_v28, 0.0  ;;  %v633_v9 = vmul.f32 0.75, %v571_v57  ;;  %v2376_v10 = vpop.f32.mrb[9].mxu1  ;;  %v2378_v14 = vpop.f32.mrb[10].mxu0  ;;  %v587_v53 = vadd.f32 %v2249_v20, %v548_v58  ;;  %v537_v19 = vmul.f32 %v1970_v54, %v2244_v18 }
 0x103   : > { %1180 = vst [vmem:[%s2381_s14] sm:$0xff] %v1116_v33  ;;  %1184 = vst [vmem:[%s2381_s14 + $0x40] sm:$0xff] %v1120_v34  ;;  %v1152_v15 = vmax.f32 %v1038_v35, 0.0  ;;  %v1548_v16 = vadd.f32 %v2363_v30, %v1484_v36  ;;  %v2388_v57 = vpop.f32.mrb[10].mxu1  ;;  %v2390_v21 = vpop.f32.mrb[11].mxu0  ;;  %v667_v25 = vadd.f32 %v2277_v49, %v603_v45  ;;  %v553_v28 = vmul.f32 %v2299_v59, %v2244_v18 }
 0x104   : > { %1874 = vst [vmem:[%s2381_s14 + $0x20] sm:$0xff] %v1628_v41  ;;  %v665_v24 = vadd.f32 %v633_v9, %v603_v45  ;;  %v699_v26 = vadd.f32 %v633_v9, %v2275_v48  ;;  %v2397_v29 = vpop.f32.mrb[11].mxu1  ;;  %v2400_v33 = vmul.f32 0.25, %v587_v53  ;;  %v2402_v54 = vmul.f32 0.75, %v587_v53 }
 0x105   : > { %1216 = vst [vmem:[%s2381_s14 + $0x240] sm:$0xff] %v1152_v15  ;;  %v1660_v58 = vmax.f32 %v1548_v16, 0.0  ;;  %v576_v34 = vadd.f32 %v2249_v20, %v537_v19  ;;  %v767_v36 = vrot.slane %v667_v25, 7  ;;  %v864_v27 = vrot.slane %v667_v25, 1 }
 0x106   : > { %3436 = vst [vmem:[#allocation7_spill] sm:$0xff] %v2400_v33  ;;  %3437 = vst [vmem:[#allocation8_spill] sm:$0xff] %v2402_v54  ;;  %v764_v35 = vrot.slane %v665_v24, 7  ;;  %v861_v41 = vrot.slane %v665_v24, 1  ;;  %v989_v45 = vmul.f32 0.75, %v665_v24  ;;  %v991_v9 = vmul.f32 0.75, %v667_v25 }
 0x107   : > { %1906 = vst [vmem:[%s2381_s14 + $0x220] sm:$0xff] %v1660_v58  ;;  %v1277_v23 = vrot.slane %v699_v26, 7  ;;  %v1373_v17 = vrot.slane %v699_v26, 1  ;;  %v768_v15 = vsel %vm762_vm2, %v766_v62, %v767_v36  ;;  %v865_v53 = vsel %vm859_vm3, %v863_v0, %v864_v27 }
 0x108   : > { %v765_v59 = vsel %vm762_vm2, %v763_v61, %v764_v35  ;;  %v862_v16 = vsel %vm859_vm3, %v860_v63, %v861_v41  ;;  %v2418_v19 = vpop.f32.mrb[12].mxu0  ;;  %v940_v58 = vsel %vm859_vm3, %v861_v41, %v665_v24  ;;  %v941_v12 = vsel %vm859_vm3, %v864_v27, %v667_v25 }
 0x109   : > { %v957_v6 = vmul.f32 0.25, %v765_v59  ;;  %v959_v61 = vmul.f32 0.25, %v768_v15  ;;  %v2422_v35 = vpop.f32.mrb[12].mxu1  ;;  %v1052_v5 = vmul.f32 0.25, %v862_v16  ;;  %v1053_v62 = vmul.f32 0.25, %v940_v58  ;;  %v2430_v24 = vpop.f32.mrb[13].mxu0 }
 0x10a   : > { %3438 = vst [vmem:[#allocation9_spill] sm:$0xff] %v2422_v35  ;;  %v1054_v36 = vmul.f32 0.25, %v865_v53  ;;  %v1055_v50 = vmul.f32 0.25, %v941_v12  ;;  %v3439_v51 = vrot.slane %v2285_v52, 7  ;;  %v3440_v47 = vrot.slane %v2285_v52, 1  ;;  %3441 = vst [vmem:[#allocation10_spill] sm:$0xff] %v2430_v24 }
 0x10b   : > { %v1021_v46 = vadd.f32 %v989_v45, %v957_v6  ;;  %v1023_v63 = vadd.f32 %v991_v9, %v959_v61  ;;  %v1084_v25 = vadd.f32 %v1052_v5, %v2312_v3  ;;  %v1085_v41 = vadd.f32 %v1053_v62, %v989_v45 }
 0x10c   : > { %v1278_v0 = vsel %vm762_vm2, %v3439_v51, %v1277_v23  ;;  %v1374_v27 = vsel %vm859_vm3, %v3440_v47, %v1373_v17  ;;  %v1086_v59 = vadd.f32 %v1054_v36, %v2315_v4  ;;  %v1087_v6 = vadd.f32 %v1055_v50, %v991_v9 }
 0x10d   : > { %v1118_v12 = vmax.f32 %v1021_v46, 0.0  ;;  %v1122_v15 = vmax.f32 %v1023_v63, 0.0  ;;  %v1452_v23 = vsel %vm859_vm3, %v1373_v17, %v699_v26  ;;  %v1469_v52 = vmul.f32 0.25, %v1278_v0  ;;  %v2451_v63 = vpop.f32.mrb[13].mxu1 }
 0x10e   : > { %v1117_v16 = vmax.f32 %v1084_v25, 0.0  ;;  %v1119_v53 = vmax.f32 %v1085_v41, 0.0  ;;  %v1121_v47 = vmax.f32 %v1086_v59, 0.0  ;;  %v1123_v58 = vmax.f32 %v1087_v6, 0.0  ;;  %3442 = vst [vmem:[#allocation11_spill] sm:$0xff] %v2451_v63 }
 0x10f   : > { %1182 = vst [vmem:[%s2381_s14 + $0x10] sm:$0xff] %v1118_v12  ;;  %1186 = vst [vmem:[%s2381_s14 + $0x50] sm:$0xff] %v1122_v15  ;;  %v1501_v3 = vmul.f32 0.75, %v699_v26  ;;  %v1564_v5 = vmul.f32 0.25, %v1374_v27  ;;  %v1565_v45 = vmul.f32 0.25, %v1452_v23  ;;  %v683_v4 = vadd.f32 %v2374_v44, %v2400_v33 }
 0x110   : > { %1181 = vst [vmem:[%s2381_s14 + $0x8] sm:$0xff] %v1117_v16  ;;  %1183 = vst [vmem:[%s2381_s14 + $0x18] sm:$0xff] %v1119_v53  ;;  %v715_v46 = vadd.f32 %v2402_v54, %v2365_v31  ;;  %v2445_v17 = vmul.f32 0.25, %v576_v34  ;;  %v2447_v9 = vmul.f32 0.75, %v576_v34  ;;  %v592_v61 = vadd.f32 %v2249_v20, %v553_v28 }
 0x111   : > { %1185 = vst [vmem:[%s2381_s14 + $0x48] sm:$0xff] %v1121_v47  ;;  %1187 = vst [vmem:[%s2381_s14 + $0x58] sm:$0xff] %v1123_v58  ;;  %v1533_v62 = vadd.f32 %v1501_v3, %v1469_v52  ;;  %v1596_v26 = vadd.f32 %v1564_v5, %v2332_v11  ;;  %v1597_v36 = vadd.f32 %v1565_v45, %v1501_v3  ;;  %v791_v50 = vrot.slane %v683_v4, 7 }
 0x112   : > { %v888_v51 = vrot.slane %v683_v4, 1  ;;  %v1007_v0 = vmul.f32 0.75, %v683_v4  ;;  %v1301_v27 = vrot.slane %v715_v46, 7  ;;  %v1397_v25 = vrot.slane %v715_v46, 1 }
 0x113   : > { %v1629_v41 = vmax.f32 %v1596_v26, 0.0  ;;  %v1630_v59 = vmax.f32 %v1533_v62, 0.0  ;;  %v1631_v34 = vmax.f32 %v1597_v36, 0.0  ;;  %v3443_v6 = vrot.slane %v2291_v55, 7 }
 0x114   : > { %v3444_v11 = vrot.slane %v2291_v55, 1  ;;  %v949_v15 = vsel %vm859_vm3, %v888_v51, %v683_v4  ;;  %v3445_v52 = vrot.slane %v2295_v56, 7  ;;  %v3446_v58 = vrot.slane %v2295_v56, 1 }
 0x115   : > { %v792_v28 = vsel %vm762_vm2, %v3443_v6, %v791_v50  ;;  %1875 = vst [vmem:[%s2381_s14 + $0x28] sm:$0xff] %v1629_v41  ;;  %1876 = vst [vmem:[%s2381_s14 + $0x30] sm:$0xff] %v1630_v59  ;;  %v1071_v47 = vmul.f32 0.25, %v949_v15  ;;  %v1460_v55 = vsel %vm859_vm3, %v1397_v25, %v715_v46  ;;  %v1517_v4 = vmul.f32 0.75, %v715_v46 }
 0x116   : > { %v889_v12 = vsel %vm859_vm3, %v3444_v11, %v888_v51  ;;  %v975_v23 = vmul.f32 0.25, %v792_v28  ;;  %v1302_v16 = vsel %vm762_vm2, %v3445_v52, %v1301_v27  ;;  %1877 = vst [vmem:[%s2381_s14 + $0x38] sm:$0xff] %v1631_v34  ;;  %v1398_v3 = vsel %vm859_vm3, %v3446_v58, %v1397_v25  ;;  %v2476_v25 = vpop.f32.mrb[14].mxu0 }
 0x117   : > { %v1070_v53 = vmul.f32 0.25, %v889_v12  ;;  %v1485_v45 = vmul.f32 0.25, %v1302_v16  ;;  %v1580_v62 = vmul.f32 0.25, %v1398_v3  ;;  %v1103_v36 = vadd.f32 %v1071_v47, %v1007_v0  ;;  %3447 = vst [vmem:[#allocation12_spill] sm:$0xff] %v2476_v25 }
 0x118   : > { %v1039_v5 = vadd.f32 %v1007_v0, %v975_v23  ;;  %v1581_v50 = vmul.f32 0.25, %v1460_v55  ;;  %v2471_v51 = vmul.f32 0.25, %v592_v61  ;;  %v2474_v59 = vmul.f32 0.75, %v592_v61 }
 0x119   : > { %v1102_v26 = vadd.f32 %v1070_v53, %v2351_v22  ;;  %v1549_v41 = vadd.f32 %v1517_v4, %v1485_v45  ;;  %v1612_v56 = vadd.f32 %v1580_v62, %v2363_v30  ;;  %v1155_v46 = vmax.f32 %v1103_v36, 0.0  ;;  %v2539_v36 = vpop.f32.mrb[14].mxu1 }
 0x11a   : > { %v1154_v27 = vmax.f32 %v1039_v5, 0.0  ;;  %v1613_v6 = vadd.f32 %v1581_v50, %v1517_v4  ;;  %v535_v22 = vmul.f32 %v2244_v18, %v2301_v60  ;;  %v551_v11 = vmul.f32 %v2244_v18, %v2307_v1  ;;  %3450 = vst [vmem:[#allocation15_spill] sm:$0xff] %v2539_v36  ;;  %v2653_v36 = vpop.f32.mrb[15].mxu1 }
 0x11b   : > { %v1153_v34 = vmax.f32 %v1102_v26, 0.0  ;;  %v1661_v0 = vmax.f32 %v1612_v56, 0.0  ;;  %v1662_v28 = vmax.f32 %v1549_v41, 0.0  ;;  %v538_v30 = vmul.f32 %v2309_v2, %v2244_v18  ;;  %1219 = vst [vmem:[%s2381_s14 + $0x258] sm:$0xff] %v1155_v46  ;;  %3452 = vst [vmem:[#allocation17_spill] sm:$0xff] %v2653_v36 }
 0x11c   : > { %1218 = vst [vmem:[%s2381_s14 + $0x250] sm:$0xff] %v1154_v27  ;;  %v1663_v61 = vmax.f32 %v1613_v6, 0.0  ;;  %v574_v12 = vadd.f32 %v2249_v20, %v535_v22  ;;  %v554_v15 = vmul.f32 %v2319_v7, %v2244_v18  ;;  %v536_v60 = vmul.f32 %v2244_v18, %v2321_v8 }
 0x11d   : > { %1217 = vst [vmem:[%s2381_s14 + $0x248] sm:$0xff] %v1153_v34  ;;  %1907 = vst [vmem:[%s2381_s14 + $0x228] sm:$0xff] %v1661_v0  ;;  %v590_v23 = vadd.f32 %v2249_v20, %v551_v11  ;;  %v577_v1 = vadd.f32 %v2249_v20, %v538_v30  ;;  %v2498_v2 = vmul.f32 %v2244_v18, %v2335_v13 }
 0x11e   : > { %1908 = vst [vmem:[%s2381_s14 + $0x230] sm:$0xff] %v1662_v28  ;;  %v2502_v52 = vmul.f32 %v2367_v32, %v2244_v18  ;;  %1909 = vst [vmem:[%s2381_s14 + $0x238] sm:$0xff] %v1663_v61  ;;  %v606_v16 = vmul.f32 0.25, %v574_v12  ;;  %v636_v7 = vmul.f32 0.75, %v574_v12  ;;  %v2506_v53 = vadd.f32 %v2249_v20, %v554_v15 }
 0x11f   : > { %v2509_v8 = vadd.f32 %v2249_v20, %v536_v60  ;;  %v622_v47 = vmul.f32 0.25, %v590_v23  ;;  %v652_v58 = vmul.f32 0.75, %v590_v23  ;;  %v2511_v3 = vmul.f32 0.25, %v577_v1 }
 0x120   : > { %v2513_v55 = vmul.f32 0.75, %v577_v1  ;;  %v2516_v13 = vadd.f32 %v636_v7, %v2261_v38  ;;  %v2519_v32 = vadd.f32 %v2447_v9, %v606_v16  ;;  %v2522_v5 = vadd.f32 %v2263_v39, %v606_v16  ;;  %v2577_v1 = vpop.f32.mrb[15].mxu0 }
 0x121   : > { %3448 = vst [vmem:[#allocation13_spill] sm:$0xff] %v2511_v3  ;;  %v2525_v45 = vadd.f32 %v636_v7, %v2445_v17  ;;  %v2528_v4 = vadd.f32 %v652_v58, %v2267_v42  ;;  %v2531_v62 = vadd.f32 %v2474_v59, %v622_v47  ;;  %v2534_v26 = vadd.f32 %v2269_v43, %v622_v47 }
 0x122   : > { %3449 = vst [vmem:[#allocation14_spill] sm:$0xff] %v2513_v55  ;;  %v2537_v38 = vadd.f32 %v652_v58, %v2471_v51  ;;  %v3421_v39 = vrot.slane %v2516_v13, 7  ;;  %v3419_v50 = vrot.slane %v2519_v32, 7  ;;  %v2546_v41 = vmul.f32 0.75, %v2516_v13  ;;  %3451 = vst [vmem:[#allocation16_spill] sm:$0xff] %v2577_v1 }
 0x123   : > { %v2549_v56 = vmul.f32 0.75, %v2519_v32  ;;  %v3417_v43 = vrot.slane %v2522_v5, 7  ;;  %v3414_v34 = vrot.slane %v2525_v45, 7  ;;  %v2572_v60 = vmul.f32 0.75, %v2522_v5 }
 0x124   : > { %v845_v46 = vsel %vm762_vm2, %v2516_v13, %v3421_v39  ;;  %v846_v6 = vsel %vm762_vm2, %v2519_v32, %v3419_v50  ;;  %v2575_v23 = vmul.f32 0.75, %v2525_v45  ;;  %v3415_v47 = vrot.slane %v2528_v4, 7 }
 0x125   : > { %v960_v28 = vmul.f32 0.25, %v845_v46  ;;  %v962_v11 = vmul.f32 0.25, %v846_v6  ;;  %v1357_v30 = vsel %vm762_vm2, %v2522_v5, %v3417_v43  ;;  %v1358_v61 = vsel %vm762_vm2, %v2525_v45, %v3414_v34 }
 0x126   : > { %v1470_v12 = vmul.f32 0.25, %v1357_v30  ;;  %v1472_v15 = vmul.f32 0.25, %v1358_v61  ;;  %v3416_v58 = vrot.slane %v2531_v62, 7  ;;  %v2598_v61 = vmul.f32 0.75, %v2528_v4 }
 0x127   : > { %v1024_v16 = vadd.f32 %v2546_v41, %v960_v28  ;;  %v1026_v7 = vadd.f32 %v2549_v56, %v962_v11  ;;  %v853_v11 = vsel %vm762_vm2, %v2528_v4, %v3415_v47  ;;  %v3420_v47 = vrot.slane %v2537_v38, 7 }
 0x128   : > { %v1534_v46 = vadd.f32 %v2572_v60, %v1470_v12  ;;  %v1536_v6 = vadd.f32 %v2575_v23, %v1472_v15  ;;  %v854_v12 = vsel %vm762_vm2, %v2531_v62, %v3416_v58  ;;  %v976_v34 = vmul.f32 0.25, %v853_v11 }
 0x129   : > { %v1124_v0 = vmax.f32 %v1024_v16, 0.0  ;;  %v1128_v28 = vmax.f32 %v1026_v7, 0.0  ;;  %v978_v30 = vmul.f32 0.25, %v854_v12  ;;  %v2601_v16 = vmul.f32 0.75, %v2531_v62 }
 0x12a   : > { %v1632_v22 = vmax.f32 %v1534_v46, 0.0  ;;  %v1636_v15 = vmax.f32 %v1536_v6, 0.0  ;;  %v3418_v7 = vrot.slane %v2534_v26, 7  ;;  %v2610_v6 = vmul.f32 0.75, %v2534_v26 }
 0x12b   : > { %1188 = vst [vmem:[%s2381_s14 + $0x80] sm:$0xff] %v1124_v0  ;;  %1192 = vst [vmem:[%s2381_s14 + $0xc0] sm:$0xff] %v1128_v28  ;;  %v2613_v0 = vmul.f32 0.75, %v2537_v38  ;;  %v1040_v28 = vadd.f32 %v2598_v61, %v976_v34  ;;  %v1042_v11 = vadd.f32 %v2601_v16, %v978_v30  ;;  %v1366_v12 = vsel %vm762_vm2, %v2537_v38, %v3420_v47 }
 0x12c   : > { %1878 = vst [vmem:[%s2381_s14 + $0x60] sm:$0xff] %v1632_v22  ;;  %1882 = vst [vmem:[%s2381_s14 + $0xa0] sm:$0xff] %v1636_v15  ;;  %v1365_v22 = vsel %vm762_vm2, %v2534_v26, %v3418_v7  ;;  %v1488_v46 = vmul.f32 0.25, %v1366_v12  ;;  %v2626_v58 = vmul.f32 0.25, %v2506_v53  ;;  %v2629_v34 = vmul.f32 0.75, %v2506_v53 }
 0x12d   : > { %v1486_v15 = vmul.f32 0.25, %v1365_v22  ;;  %v1156_v30 = vmax.f32 %v1040_v28, 0.0  ;;  %v1160_v43 = vmax.f32 %v1042_v11, 0.0  ;;  %v607_v42 = vmul.f32 0.25, %v2509_v8 }
 0x12e   : > { %v637_v27 = vmul.f32 0.75, %v2509_v8  ;;  %v1552_v50 = vadd.f32 %v2613_v0, %v1488_v46  ;;  %v591_v22 = vadd.f32 %v2249_v20, %v2498_v2  ;;  %v2639_v12 = vadd.f32 %v2249_v20, %v2502_v52 }
 0x12f   : > { %v1550_v7 = vadd.f32 %v2610_v6, %v1486_v15  ;;  %1220 = vst [vmem:[%s2381_s14 + $0x280] sm:$0xff] %v1156_v30  ;;  %1224 = vst [vmem:[%s2381_s14 + $0x2c0] sm:$0xff] %v1160_v43  ;;  %v671_v28 = vadd.f32 %v2513_v55, %v607_v42  ;;  %v701_v8 = vadd.f32 %v2277_v49, %v607_v42  ;;  %v3453_v49 = vrot.slane %v2516_v13, 7 }
 0x130   : > { %v669_v53 = vadd.f32 %v637_v27, %v2275_v48  ;;  %v703_v11 = vadd.f32 %v637_v27, %v2511_v3  ;;  %v1668_v15 = vmax.f32 %v1552_v50, 0.0  ;;  %v2647_v47 = vmul.f32 0.25, %v591_v22 }
 0x131   : > { %v1664_v46 = vmax.f32 %v1550_v7, 0.0  ;;  %v2649_v2 = vmul.f32 0.75, %v591_v22  ;;  %v773_v52 = vrot.slane %v671_v28, 7  ;;  %v870_v54 = vrot.slane %v671_v28, 1 }
 0x132   : > { %v770_v39 = vrot.slane %v669_v53, 7  ;;  %v867_v33 = vrot.slane %v669_v53, 1  ;;  %1914 = vst [vmem:[%s2381_s14 + $0x2a0] sm:$0xff] %v1668_v15  ;;  %v993_v43 = vmul.f32 0.75, %v669_v53  ;;  %v995_v48 = vmul.f32 0.75, %v671_v28 }
 0x133   : > { %1910 = vst [vmem:[%s2381_s14 + $0x260] sm:$0xff] %v1664_v46  ;;  %v1280_v30 = vrot.slane %v701_v8, 7  ;;  %v1283_v1 = vrot.slane %v703_v11, 7  ;;  %v3454_v27 = vrot.slane %v2519_v32, 7  ;;  %v3455_v7 = vrot.slane %v2516_v13, 1 }
 0x134   : > { %v771_v50 = vsel %vm762_vm2, %v3453_v49, %v770_v39  ;;  %v3456_v46 = vrot.slane %v2519_v32, 1  ;;  %v942_v25 = vsel %vm859_vm3, %v867_v33, %v669_v53  ;;  %v943_v36 = vsel %vm859_vm3, %v870_v54, %v671_v28 }
 0x135   : > { %v774_v42 = vsel %vm762_vm2, %v3454_v27, %v773_v52  ;;  %v868_v22 = vsel %vm859_vm3, %v3455_v7, %v867_v33  ;;  %v961_v63 = vmul.f32 0.25, %v771_v50  ;;  %v1057_v39 = vmul.f32 0.25, %v942_v25 }
 0x136   : > { %v871_v15 = vsel %vm859_vm3, %v3456_v46, %v870_v54  ;;  %v963_v24 = vmul.f32 0.25, %v774_v42  ;;  %v1056_v35 = vmul.f32 0.25, %v868_v22  ;;  %v1059_v55 = vmul.f32 0.25, %v943_v36 }
 0x137   : > { %v1058_v49 = vmul.f32 0.25, %v871_v15  ;;  %v1025_v3 = vadd.f32 %v993_v43, %v961_v63  ;;  %v3457_v13 = vrot.slane %v2522_v5, 7  ;;  %v3458_v27 = vrot.slane %v2525_v45, 7 }
 0x138   : > { %v1027_v52 = vadd.f32 %v995_v48, %v963_v24  ;;  %v1088_v54 = vadd.f32 %v1056_v35, %v2546_v41  ;;  %v1089_v53 = vadd.f32 %v1057_v39, %v993_v43  ;;  %v1091_v25 = vadd.f32 %v1059_v55, %v995_v48 }
 0x139   : > { %v1281_v32 = vsel %vm762_vm2, %v3457_v13, %v1280_v30  ;;  %v1284_v33 = vsel %vm762_vm2, %v3458_v27, %v1283_v1  ;;  %v1090_v28 = vadd.f32 %v1058_v49, %v2549_v56  ;;  %v1126_v63 = vmax.f32 %v1025_v3, 0.0 }
 0x13a   : > { %v1130_v24 = vmax.f32 %v1027_v52, 0.0  ;;  %v1376_v36 = vrot.slane %v701_v8, 1  ;;  %v1379_v50 = vrot.slane %v703_v11, 1  ;;  %v1125_v42 = vmax.f32 %v1088_v54, 0.0 }
 0x13b   : > { %v1127_v30 = vmax.f32 %v1089_v53, 0.0  ;;  %v1129_v7 = vmax.f32 %v1090_v28, 0.0  ;;  %v1131_v22 = vmax.f32 %v1091_v25, 0.0  ;;  %1190 = vst [vmem:[%s2381_s14 + $0x90] sm:$0xff] %v1126_v63  ;;  %v3459_v35 = vrot.slane %v2522_v5, 1 }
 0x13c   : > { %1194 = vst [vmem:[%s2381_s14 + $0xd0] sm:$0xff] %v1130_v24  ;;  %v3460_v56 = vrot.slane %v2525_v45, 1  ;;  %v1453_v3 = vsel %vm859_vm3, %v1376_v36, %v701_v8  ;;  %v1454_v1 = vsel %vm859_vm3, %v1379_v50, %v703_v11  ;;  %1189 = vst [vmem:[%s2381_s14 + $0x88] sm:$0xff] %v1125_v42  ;;  %v1471_v43 = vmul.f32 0.25, %v1281_v32 }
 0x13d   : > { %v1377_v41 = vsel %vm859_vm3, %v3459_v35, %v1376_v36  ;;  %1191 = vst [vmem:[%s2381_s14 + $0x98] sm:$0xff] %v1127_v30  ;;  %1193 = vst [vmem:[%s2381_s14 + $0xc8] sm:$0xff] %v1129_v7  ;;  %v1473_v48 = vmul.f32 0.25, %v1284_v33  ;;  %v1503_v46 = vmul.f32 0.75, %v701_v8  ;;  %v1505_v15 = vmul.f32 0.75, %v703_v11 }
 0x13e   : > { %v1380_v55 = vsel %vm859_vm3, %v3460_v56, %v1379_v50  ;;  %1195 = vst [vmem:[%s2381_s14 + $0xd8] sm:$0xff] %v1131_v22  ;;  %v1566_v39 = vmul.f32 0.25, %v1377_v41  ;;  %v1567_v5 = vmul.f32 0.25, %v1453_v3  ;;  %v1569_v52 = vmul.f32 0.25, %v1454_v1 }
 0x13f   : > { %v1568_v49 = vmul.f32 0.25, %v1380_v55  ;;  %v1535_v13 = vadd.f32 %v1503_v46, %v1471_v43  ;;  %v1537_v45 = vadd.f32 %v1505_v15, %v1473_v48  ;;  %v685_v27 = vadd.f32 %v2649_v2, %v2365_v31 }
 0x140   : > { %v687_v54 = vadd.f32 %v2629_v34, %v2647_v47  ;;  %v1598_v53 = vadd.f32 %v1566_v39, %v2572_v60  ;;  %v1599_v32 = vadd.f32 %v1567_v5, %v1503_v46  ;;  %v1601_v11 = vadd.f32 %v1569_v52, %v1505_v15 }
 0x141   : > { %v1600_v8 = vadd.f32 %v1568_v49, %v2575_v23  ;;  %v1634_v33 = vmax.f32 %v1535_v13, 0.0  ;;  %v1638_v28 = vmax.f32 %v1537_v45, 0.0  ;;  %v717_v25 = vadd.f32 %v2374_v44, %v2647_v47 }
 0x142   : > { %v719_v31 = vadd.f32 %v2649_v2, %v2626_v58  ;;  %v1633_v63 = vmax.f32 %v1598_v53, 0.0  ;;  %v1635_v24 = vmax.f32 %v1599_v32, 0.0  ;;  %v1639_v60 = vmax.f32 %v1601_v11, 0.0 }
 0x143   : > { %v1637_v36 = vmax.f32 %v1600_v8, 0.0  ;;  %1880 = vst [vmem:[%s2381_s14 + $0x70] sm:$0xff] %v1634_v33  ;;  %1884 = vst [vmem:[%s2381_s14 + $0xb0] sm:$0xff] %v1638_v28  ;;  %v794_v23 = vrot.slane %v685_v27, 7  ;;  %v797_v50 = vrot.slane %v687_v54, 7  ;;  %v891_v42 = vrot.slane %v685_v27, 1 }
 0x144   : > { %v894_v30 = vrot.slane %v687_v54, 1  ;;  %1879 = vst [vmem:[%s2381_s14 + $0x68] sm:$0xff] %v1633_v63  ;;  %1881 = vst [vmem:[%s2381_s14 + $0x78] sm:$0xff] %v1635_v24  ;;  %v1009_v7 = vmul.f32 0.75, %v685_v27  ;;  %v1011_v22 = vmul.f32 0.75, %v687_v54  ;;  %v1304_v44 = vrot.slane %v717_v25, 7 }
 0x145   : > { %1883 = vst [vmem:[%s2381_s14 + $0xa8] sm:$0xff] %v1637_v36  ;;  %1885 = vst [vmem:[%s2381_s14 + $0xb8] sm:$0xff] %v1639_v60  ;;  %v1307_v47 = vrot.slane %v719_v31, 7  ;;  %v3461_v2 = vrot.slane %v2528_v4, 7  ;;  %v3462_v41 = vrot.slane %v2531_v62, 7  ;;  %v3463_v55 = vrot.slane %v2528_v4, 1 }
 0x146   : > { %v3464_v1 = vrot.slane %v2531_v62, 1  ;;  %v950_v48 = vsel %vm859_vm3, %v891_v42, %v685_v27  ;;  %v951_v46 = vsel %vm859_vm3, %v894_v30, %v687_v54  ;;  %v3465_v4 = vrot.slane %v2534_v26, 7 }
 0x147   : > { %v795_v35 = vsel %vm762_vm2, %v3461_v2, %v794_v23  ;;  %v798_v56 = vsel %vm762_vm2, %v3462_v41, %v797_v50  ;;  %v892_v3 = vsel %vm859_vm3, %v3463_v55, %v891_v42  ;;  %v1073_v49 = vmul.f32 0.25, %v950_v48 }
 0x148   : > { %v895_v43 = vsel %vm859_vm3, %v3464_v1, %v894_v30  ;;  %v977_v15 = vmul.f32 0.25, %v795_v35  ;;  %v979_v39 = vmul.f32 0.25, %v798_v56  ;;  %v1072_v5 = vmul.f32 0.25, %v892_v3 }
 0x149   : > { %v1074_v52 = vmul.f32 0.25, %v895_v43  ;;  %v1075_v13 = vmul.f32 0.25, %v951_v46  ;;  %v1305_v62 = vsel %vm762_vm2, %v3465_v4, %v1304_v44  ;;  %v3466_v32 = vrot.slane %v2537_v38, 7 }
 0x14a   : > { %v1041_v45 = vadd.f32 %v1009_v7, %v977_v15  ;;  %v1043_v53 = vadd.f32 %v1011_v22, %v979_v39  ;;  %v1104_v54 = vadd.f32 %v1072_v5, %v2598_v61  ;;  %v1105_v8 = vadd.f32 %v1073_v49, %v1009_v7 }
 0x14b   : > { %v1308_v27 = vsel %vm762_vm2, %v3466_v32, %v1307_v47  ;;  %v1106_v11 = vadd.f32 %v1074_v52, %v2601_v16  ;;  %v1107_v33 = vadd.f32 %v1075_v13, %v1011_v22  ;;  %v1400_v24 = vrot.slane %v717_v25, 1 }
 0x14c   : > { %v1158_v28 = vmax.f32 %v1041_v45, 0.0  ;;  %v1162_v63 = vmax.f32 %v1043_v53, 0.0  ;;  %v1403_v36 = vrot.slane %v719_v31, 1  ;;  %v1157_v60 = vmax.f32 %v1104_v54, 0.0 }
 0x14d   : > { %v1159_v23 = vmax.f32 %v1105_v8, 0.0  ;;  %v1161_v50 = vmax.f32 %v1106_v11, 0.0  ;;  %v1163_v42 = vmax.f32 %v1107_v33, 0.0  ;;  %v3467_v61 = vrot.slane %v2534_v26, 1 }
 0x14e   : > { %1222 = vst [vmem:[%s2381_s14 + $0x290] sm:$0xff] %v1158_v28  ;;  %1226 = vst [vmem:[%s2381_s14 + $0x2d0] sm:$0xff] %v1162_v63  ;;  %v3468_v16 = vrot.slane %v2537_v38, 1  ;;  %v1461_v22 = vsel %vm859_vm3, %v1400_v24, %v717_v25  ;;  %v1462_v44 = vsel %vm859_vm3, %v1403_v36, %v719_v31  ;;  %v1487_v47 = vmul.f32 0.25, %v1305_v62 }
 0x14f   : > { %v1401_v30 = vsel %vm859_vm3, %v3467_v61, %v1400_v24  ;;  %1221 = vst [vmem:[%s2381_s14 + $0x288] sm:$0xff] %v1157_v60  ;;  %1223 = vst [vmem:[%s2381_s14 + $0x298] sm:$0xff] %v1159_v23  ;;  %v1489_v2 = vmul.f32 0.25, %v1308_v27  ;;  %v1519_v35 = vmul.f32 0.75, %v717_v25  ;;  %v1521_v41 = vmul.f32 0.75, %v719_v31 }
 0x150   : > { %v1404_v7 = vsel %vm859_vm3, %v3468_v16, %v1403_v36  ;;  %1225 = vst [vmem:[%s2381_s14 + $0x2c8] sm:$0xff] %v1161_v50  ;;  %1227 = vst [vmem:[%s2381_s14 + $0x2d8] sm:$0xff] %v1163_v42  ;;  %v1582_v56 = vmul.f32 0.25, %v1401_v30  ;;  %v1583_v26 = vmul.f32 0.25, %v1461_v22  ;;  %v1585_v3 = vmul.f32 0.25, %v1462_v44 }
 0x151   : > { %v1584_v55 = vmul.f32 0.25, %v1404_v7  ;;  %v1551_v1 = vadd.f32 %v1519_v35, %v1487_v47  ;;  %v1553_v38 = vadd.f32 %v1521_v41, %v1489_v2  ;;  %v2744_v43 = vmul.f32 0.25, %v2639_v12 }
 0x152   : > { %v2747_v48 = vmul.f32 0.75, %v2639_v12  ;;  %v1614_v46 = vadd.f32 %v1582_v56, %v2610_v6  ;;  %v1615_v15 = vadd.f32 %v1583_v26, %v1519_v35  ;;  %v1617_v31 = vadd.f32 %v1585_v3, %v1521_v41 }
 0x153   : > { %v1616_v25 = vadd.f32 %v1584_v55, %v2613_v0  ;;  %v1666_v39 = vmax.f32 %v1551_v1, 0.0  ;;  %v1670_v5 = vmax.f32 %v1553_v38, 0.0  ;;  %v557_v49 = vmul.f32 %v2370_v37, %v2244_v18 }
 0x154   : > { %v539_v52 = vmul.f32 %v2244_v18, %v2372_v40  ;;  %v1665_v12 = vmax.f32 %v1614_v46, 0.0  ;;  %v1667_v13 = vmax.f32 %v1615_v15, 0.0  ;;  %v1671_v6 = vmax.f32 %v1617_v31, 0.0 }
 0x155   : > { %v1669_v45 = vmax.f32 %v1616_v25, 0.0  ;;  %1912 = vst [vmem:[%s2381_s14 + $0x270] sm:$0xff] %v1666_v39  ;;  %1916 = vst [vmem:[%s2381_s14 + $0x2b0] sm:$0xff] %v1670_v5  ;;  %v596_v0 = vadd.f32 %v2249_v20, %v557_v49  ;;  %v555_v4 = vmul.f32 %v2244_v18, %v2376_v10  ;;  %v542_v62 = vmul.f32 %v2378_v14, %v2244_v18 }
 0x156   : > { %v578_v53 = vadd.f32 %v2249_v20, %v539_v52  ;;  %1911 = vst [vmem:[%s2381_s14 + $0x268] sm:$0xff] %v1665_v12  ;;  %1913 = vst [vmem:[%s2381_s14 + $0x278] sm:$0xff] %v1667_v13  ;;  %v558_v37 = vmul.f32 %v2388_v57, %v2244_v18  ;;  %v540_v40 = vmul.f32 %v2244_v18, %v2390_v21 }
 0x157   : > { %1915 = vst [vmem:[%s2381_s14 + $0x2a8] sm:$0xff] %v1669_v45  ;;  %1917 = vst [vmem:[%s2381_s14 + $0x2b8] sm:$0xff] %v1671_v6  ;;  %v2773_v32 = vmul.f32 %v2244_v18, %v2397_v29  ;;  %v2777_v10 = vmul.f32 %v2418_v19, %v2244_v18  ;;  %v2779_v27 = vmul.f32 0.25, %v596_v0  ;;  %v2781_v14 = vmul.f32 0.75, %v596_v0 }
 0x158   : > { %v610_v54 = vmul.f32 0.25, %v578_v53  ;;  %v640_v8 = vmul.f32 0.75, %v578_v53  ;;  %v594_v11 = vadd.f32 %v2249_v20, %v555_v4  ;;  %v581_v57 = vadd.f32 %v2249_v20, %v542_v62 }
 0x159   : > { %v2786_v21 = vadd.f32 %v2249_v20, %v558_v37  ;;  %v2789_v29 = vadd.f32 %v2249_v20, %v540_v40 }
 0x15a   : > { %v2792_v33 = vadd.f32 %v640_v8, %v2445_v17  ;;  %v2795_v18 = vadd.f32 %v2747_v48, %v610_v54  ;;  %v2798_v19 = vadd.f32 %v2447_v9, %v610_v54  ;;  %v2801_v28 = vadd.f32 %v640_v8, %v2744_v43 }
 0x15b   : > { %v626_v63 = vmul.f32 0.25, %v594_v11  ;;  %v656_v24 = vmul.f32 0.75, %v594_v11  ;;  %v2803_v36 = vmul.f32 0.25, %v581_v57  ;;  %v2805_v60 = vmul.f32 0.75, %v581_v57 }
 0x15c   : > { %v775_v20 = vrot.slane %v2792_v33, 7  ;;  %v778_v17 = vrot.slane %v2795_v18, 7  ;;  %v872_v23 = vrot.slane %v2792_v33, 1  ;;  %v875_v50 = vrot.slane %v2795_v18, 1 }
 0x15d   : > { %v2812_v9 = vmul.f32 0.75, %v2792_v33  ;;  %v2815_v42 = vmul.f32 0.75, %v2795_v18  ;;  %v1285_v61 = vrot.slane %v2798_v19, 7  ;;  %v1288_v30 = vrot.slane %v2801_v28, 7 }
 0x15e   : > { %v847_v16 = vsel %vm762_vm2, %v2792_v33, %v775_v20  ;;  %v848_v7 = vsel %vm762_vm2, %v2795_v18, %v778_v17  ;;  %v1381_v22 = vrot.slane %v2798_v19, 1  ;;  %v1384_v44 = vrot.slane %v2801_v28, 1 }
 0x15f   : > { %v964_v47 = vmul.f32 0.25, %v847_v16  ;;  %v966_v2 = vmul.f32 0.25, %v848_v7  ;;  %v1359_v35 = vsel %vm762_vm2, %v2798_v19, %v1285_v61  ;;  %v1360_v41 = vsel %vm762_vm2, %v2801_v28, %v1288_v30 }
 0x160   : > { %v1474_v56 = vmul.f32 0.25, %v1359_v35  ;;  %v1476_v26 = vmul.f32 0.25, %v1360_v41  ;;  %v2838_v55 = vmul.f32 0.75, %v2798_v19  ;;  %v2841_v3 = vmul.f32 0.75, %v2801_v28 }
 0x161   : > { %v1028_v1 = vadd.f32 %v2812_v9, %v964_v47  ;;  %v1030_v38 = vadd.f32 %v2815_v42, %v966_v2  ;;  %v2846_v46 = vadd.f32 %v656_v24, %v2471_v51  ;;  %v2849_v15 = vadd.f32 %v2781_v14, %v626_v63 }
 0x162   : > { %v1538_v25 = vadd.f32 %v2838_v55, %v1474_v56  ;;  %v1540_v31 = vadd.f32 %v2841_v3, %v1476_v26  ;;  %v2854_v39 = vadd.f32 %v2474_v59, %v626_v63  ;;  %v2857_v5 = vadd.f32 %v656_v24, %v2779_v27 }
 0x163   : > { %v1132_v49 = vmax.f32 %v1028_v1, 0.0  ;;  %v1136_v52 = vmax.f32 %v1030_v38, 0.0  ;;  %v799_v51 = vrot.slane %v2846_v46, 7  ;;  %v802_v12 = vrot.slane %v2849_v15, 7 }
 0x164   : > { %v1640_v13 = vmax.f32 %v1538_v25, 0.0  ;;  %v1644_v45 = vmax.f32 %v1540_v31, 0.0  ;;  %v896_v6 = vrot.slane %v2846_v46, 1  ;;  %v2874_v4 = vmul.f32 0.75, %v2846_v46 }
 0x165   : > { %1196 = vst [vmem:[%s2381_s14 + $0x100] sm:$0xff] %v1132_v49  ;;  %1200 = vst [vmem:[%s2381_s14 + $0x140] sm:$0xff] %v1136_v52  ;;  %v855_v59 = vsel %vm762_vm2, %v2846_v46, %v799_v51  ;;  %v856_v53 = vsel %vm762_vm2, %v2849_v15, %v802_v12  ;;  %v2877_v62 = vmul.f32 0.75, %v2849_v15  ;;  %v3427_v54 = vrot.slane %v2854_v39, 7 }
 0x166   : > { %1886 = vst [vmem:[%s2381_s14 + $0xe0] sm:$0xff] %v1640_v13  ;;  %1890 = vst [vmem:[%s2381_s14 + $0x120] sm:$0xff] %v1644_v45  ;;  %v980_v37 = vmul.f32 0.25, %v855_v59  ;;  %v982_v40 = vmul.f32 0.25, %v856_v53  ;;  %v3426_v8 = vrot.slane %v2857_v5, 7  ;;  %v2886_v63 = vmul.f32 0.75, %v2854_v39 }
 0x167   : > { %v2889_v24 = vmul.f32 0.75, %v2857_v5  ;;  %v1367_v47 = vsel %vm762_vm2, %v2854_v39, %v3427_v54  ;;  %v2902_v56 = vmul.f32 0.25, %v2786_v21  ;;  %v2905_v26 = vmul.f32 0.75, %v2786_v21  ;;  %v2914_v13 = vld [vmem:[%s3407_s3] ss:$0 sm:$0xff] }
 0x168   : > { %v1044_v16 = vadd.f32 %v2874_v4, %v980_v37  ;;  %v1046_v7 = vadd.f32 %v2877_v62, %v982_v40  ;;  %v1368_v2 = vsel %vm762_vm2, %v2857_v5, %v3426_v8  ;;  %v1490_v35 = vmul.f32 0.25, %v1367_v47  ;;  %v3470_v37 = vld [vmem:[#allocation14_spill] sm:$0xff] }
 0x169   : > { %v1492_v41 = vmul.f32 0.25, %v1368_v2  ;;  %v611_v25 = vmul.f32 0.25, %v2789_v29  ;;  %v641_v31 = vmul.f32 0.75, %v2789_v29  ;;  %v595_v45 = vadd.f32 %v2914_v13, %v2773_v32  ;;  %v3469_v29 = vld [vmem:[#allocation13_spill] sm:$0xff] }
 0x16a   : > { %v1164_v1 = vmax.f32 %v1044_v16, 0.0  ;;  %v1168_v38 = vmax.f32 %v1046_v7, 0.0  ;;  %v1554_v49 = vadd.f32 %v2886_v63, %v1490_v35  ;;  %v2920_v21 = vadd.f32 %v2914_v13, %v2777_v10 }
 0x16b   : > { %v1556_v52 = vadd.f32 %v2889_v24, %v1492_v41  ;;  %v673_v59 = vadd.f32 %v641_v31, %v3469_v29  ;;  %v675_v53 = vadd.f32 %v2805_v60, %v611_v25  ;;  %v705_v40 = vadd.f32 %v3470_v37, %v611_v25 }
 0x16c   : > { %1228 = vst [vmem:[%s2381_s14 + $0x300] sm:$0xff] %v1164_v1  ;;  %1232 = vst [vmem:[%s2381_s14 + $0x340] sm:$0xff] %v1168_v38  ;;  %v707_v16 = vadd.f32 %v641_v31, %v2803_v36  ;;  %v1672_v7 = vmax.f32 %v1554_v49, 0.0  ;;  %v2928_v2 = vmul.f32 0.25, %v595_v45  ;;  %v2930_v32 = vmul.f32 0.75, %v595_v45 }
 0x16d   : > { %v1676_v47 = vmax.f32 %v1556_v52, 0.0  ;;  %v776_v35 = vrot.slane %v673_v59, 7  ;;  %v779_v10 = vrot.slane %v675_v53, 7  ;;  %v873_v41 = vrot.slane %v673_v59, 1 }
 0x16e   : > { %v876_v57 = vrot.slane %v675_v53, 1  ;;  %1918 = vst [vmem:[%s2381_s14 + $0x2e0] sm:$0xff] %v1672_v7  ;;  %v997_v1 = vmul.f32 0.75, %v673_v59  ;;  %v999_v38 = vmul.f32 0.75, %v675_v53  ;;  %v1286_v29 = vrot.slane %v705_v40, 7 }
 0x16f   : > { %1922 = vst [vmem:[%s2381_s14 + $0x320] sm:$0xff] %v1676_v47  ;;  %v1289_v11 = vrot.slane %v707_v16, 7  ;;  %v777_v25 = vsel %vm762_vm2, %v775_v20, %v776_v35  ;;  %v780_v31 = vsel %vm762_vm2, %v778_v17, %v779_v10  ;;  %v874_v49 = vsel %vm859_vm3, %v872_v23, %v873_v41 }
 0x170   : > { %v877_v52 = vsel %vm859_vm3, %v875_v50, %v876_v57  ;;  %v944_v45 = vsel %vm859_vm3, %v873_v41, %v673_v59  ;;  %v945_v37 = vsel %vm859_vm3, %v876_v57, %v675_v53  ;;  %v965_v7 = vmul.f32 0.25, %v777_v25 }
 0x171   : > { %v967_v47 = vmul.f32 0.25, %v780_v31  ;;  %v1060_v8 = vmul.f32 0.25, %v874_v49  ;;  %v1061_v20 = vmul.f32 0.25, %v944_v45  ;;  %v1062_v35 = vmul.f32 0.25, %v877_v52 }
 0x172   : > { %v1063_v54 = vmul.f32 0.25, %v945_v37  ;;  %v1029_v0 = vadd.f32 %v997_v1, %v965_v7  ;;  %v1287_v33 = vsel %vm762_vm2, %v1285_v61, %v1286_v29  ;;  %v1290_v18 = vsel %vm762_vm2, %v1288_v30, %v1289_v11 }
 0x173   : > { %v1031_v17 = vadd.f32 %v999_v38, %v967_v47  ;;  %v1092_v23 = vadd.f32 %v1060_v8, %v2812_v9  ;;  %v1093_v50 = vadd.f32 %v1061_v20, %v997_v1  ;;  %v1094_v57 = vadd.f32 %v1062_v35, %v2815_v42 }
 0x174   : > { %v1095_v59 = vadd.f32 %v1063_v54, %v999_v38  ;;  %v1134_v53 = vmax.f32 %v1029_v0, 0.0  ;;  %v1382_v41 = vrot.slane %v705_v40, 1  ;;  %v1385_v25 = vrot.slane %v707_v16, 1 }
 0x175   : > { %v1138_v10 = vmax.f32 %v1031_v17, 0.0  ;;  %v1133_v31 = vmax.f32 %v1092_v23, 0.0  ;;  %v1135_v61 = vmax.f32 %v1093_v50, 0.0  ;;  %v1137_v29 = vmax.f32 %v1094_v57, 0.0 }
 0x176   : > { %v1139_v49 = vmax.f32 %v1095_v59, 0.0  ;;  %1198 = vst [vmem:[%s2381_s14 + $0x110] sm:$0xff] %v1134_v53  ;;  %v1383_v9 = vsel %vm859_vm3, %v1381_v22, %v1382_v41  ;;  %v1386_v42 = vsel %vm859_vm3, %v1384_v44, %v1385_v25  ;;  %v1455_v30 = vsel %vm859_vm3, %v1382_v41, %v705_v40 }
 0x177   : > { %1202 = vst [vmem:[%s2381_s14 + $0x150] sm:$0xff] %v1138_v10  ;;  %v1456_v0 = vsel %vm859_vm3, %v1385_v25, %v707_v16  ;;  %1197 = vst [vmem:[%s2381_s14 + $0x108] sm:$0xff] %v1133_v31  ;;  %v1475_v54 = vmul.f32 0.25, %v1287_v33  ;;  %v1477_v8 = vmul.f32 0.25, %v1290_v18  ;;  %v1507_v11 = vmul.f32 0.75, %v705_v40 }
 0x178   : > { %1199 = vst [vmem:[%s2381_s14 + $0x118] sm:$0xff] %v1135_v61  ;;  %1201 = vst [vmem:[%s2381_s14 + $0x148] sm:$0xff] %v1137_v29  ;;  %v1509_v1 = vmul.f32 0.75, %v707_v16  ;;  %v1570_v38 = vmul.f32 0.25, %v1383_v9  ;;  %v1571_v19 = vmul.f32 0.25, %v1455_v30  ;;  %v1572_v52 = vmul.f32 0.25, %v1386_v42 }
 0x179   : > { %1203 = vst [vmem:[%s2381_s14 + $0x158] sm:$0xff] %v1139_v49  ;;  %v1573_v22 = vmul.f32 0.25, %v1456_v0  ;;  %v1539_v45 = vadd.f32 %v1507_v11, %v1475_v54  ;;  %v689_v44 = vadd.f32 %v2930_v32, %v2626_v58  ;;  %v691_v37 = vadd.f32 %v2905_v26, %v2928_v2 }
 0x17a   : > { %v1541_v28 = vadd.f32 %v1509_v1, %v1477_v8  ;;  %v1602_v7 = vadd.f32 %v1570_v38, %v2838_v55  ;;  %v1603_v47 = vadd.f32 %v1571_v19, %v1507_v11  ;;  %v1604_v40 = vadd.f32 %v1572_v52, %v2841_v3 }
 0x17b   : > { %v1605_v16 = vadd.f32 %v1573_v22, %v1509_v1  ;;  %v1642_v20 = vmax.f32 %v1539_v45, 0.0  ;;  %v721_v17 = vadd.f32 %v2629_v34, %v2928_v2  ;;  %v723_v58 = vadd.f32 %v2930_v32, %v2902_v56 }
 0x17c   : > { %v1646_v35 = vmax.f32 %v1541_v28, 0.0  ;;  %v1641_v33 = vmax.f32 %v1602_v7, 0.0  ;;  %v1643_v18 = vmax.f32 %v1603_v47, 0.0  ;;  %v1645_v23 = vmax.f32 %v1604_v40, 0.0 }
 0x17d   : > { %v1647_v55 = vmax.f32 %v1605_v16, 0.0  ;;  %1888 = vst [vmem:[%s2381_s14 + $0xf0] sm:$0xff] %v1642_v20  ;;  %v800_v3 = vrot.slane %v689_v44, 7  ;;  %v803_v50 = vrot.slane %v691_v37, 7  ;;  %v897_v57 = vrot.slane %v689_v44, 1 }
 0x17e   : > { %1892 = vst [vmem:[%s2381_s14 + $0x130] sm:$0xff] %v1646_v35  ;;  %v900_v59 = vrot.slane %v691_v37, 1  ;;  %1887 = vst [vmem:[%s2381_s14 + $0xe8] sm:$0xff] %v1641_v33  ;;  %v1013_v53 = vmul.f32 0.75, %v689_v44  ;;  %v1015_v10 = vmul.f32 0.75, %v691_v37  ;;  %v1310_v34 = vrot.slane %v721_v17, 7 }
 0x17f   : > { %1889 = vst [vmem:[%s2381_s14 + $0xf8] sm:$0xff] %v1643_v18  ;;  %1891 = vst [vmem:[%s2381_s14 + $0x128] sm:$0xff] %v1645_v23  ;;  %v1313_v2 = vrot.slane %v723_v58, 7  ;;  %v801_v32 = vsel %vm762_vm2, %v799_v51, %v800_v3  ;;  %v804_v41 = vsel %vm762_vm2, %v802_v12, %v803_v50  ;;  %v898_v25 = vsel %vm859_vm3, %v896_v6, %v897_v57 }
 0x180   : > { %1893 = vst [vmem:[%s2381_s14 + $0x138] sm:$0xff] %v1647_v55  ;;  %v3471_v31 = vrot.slane %v2849_v15, 1  ;;  %v952_v29 = vsel %vm859_vm3, %v897_v57, %v689_v44  ;;  %v953_v49 = vsel %vm859_vm3, %v900_v59, %v691_v37  ;;  %v981_v9 = vmul.f32 0.25, %v801_v32 }
 0x181   : > { %v983_v42 = vmul.f32 0.25, %v804_v41  ;;  %v1076_v30 = vmul.f32 0.25, %v898_v25  ;;  %v1077_v51 = vmul.f32 0.25, %v952_v29  ;;  %v1079_v54 = vmul.f32 0.25, %v953_v49  ;;  %v3477_v29 = vld [vmem:[#allocation5_spill] sm:$0xff] }
 0x182   : > { %v901_v61 = vsel %vm859_vm3, %v3471_v31, %v900_v59  ;;  %v1045_v8 = vadd.f32 %v1013_v53, %v981_v9  ;;  %v3472_v46 = vrot.slane %v2854_v39, 7  ;;  %v3473_v6 = vrot.slane %v2857_v5, 7  ;;  %v3476_v31 = vld [vmem:[#allocation6_spill] sm:$0xff] }
 0x183   : > { %v1078_v0 = vmul.f32 0.25, %v901_v61  ;;  %v1047_v12 = vadd.f32 %v1015_v10, %v983_v42  ;;  %v1108_v1 = vadd.f32 %v1076_v30, %v2874_v4  ;;  %v1109_v38 = vadd.f32 %v1077_v51, %v1013_v53 }
 0x184   : > { %v1311_v15 = vsel %vm762_vm2, %v3472_v46, %v1310_v34  ;;  %v1314_v11 = vsel %vm762_vm2, %v3473_v6, %v1313_v2  ;;  %v1111_v52 = vadd.f32 %v1079_v54, %v1015_v10  ;;  %v1166_v22 = vmax.f32 %v1045_v8, 0.0  ;;  %v3049_v54 = vld [vmem:[%s3406_s2] ss:$0 sm:$0xff]  ;;  %v3479_v46 = vld [vmem:[#allocation10_spill] sm:$0xff] }
 0x185   : > { %v1110_v19 = vadd.f32 %v1078_v0, %v2877_v62  ;;  %v1170_v45 = vmax.f32 %v1047_v12, 0.0  ;;  %v1406_v28 = vrot.slane %v721_v17, 1  ;;  %v1409_v44 = vrot.slane %v723_v58, 1  ;;  %v3478_v8 = vld [vmem:[#allocation9_spill] sm:$0xff] }
 0x186   : > { %v1165_v37 = vmax.f32 %v1108_v1, 0.0  ;;  %v1167_v7 = vmax.f32 %v1109_v38, 0.0  ;;  %v1171_v40 = vmax.f32 %v1111_v52, 0.0  ;;  %1230 = vst [vmem:[%s2381_s14 + $0x310] sm:$0xff] %v1166_v22  ;;  %v3474_v4 = vrot.slane %v2854_v39, 1  ;;  %v3480_v1 = vld [vmem:[#allocation11_spill] sm:$0xff] }
 0x187   : > { %v1169_v47 = vmax.f32 %v1110_v19, 0.0  ;;  %1234 = vst [vmem:[%s2381_s14 + $0x350] sm:$0xff] %v1170_v45  ;;  %v3475_v62 = vrot.slane %v2857_v5, 1  ;;  %v1463_v35 = vsel %vm859_vm3, %v1406_v28, %v721_v17  ;;  %v1464_v33 = vsel %vm859_vm3, %v1409_v44, %v723_v58  ;;  %v3481_v19 = vld [vmem:[#allocation12_spill] sm:$0xff] }
 0x188   : > { %v1407_v16 = vsel %vm859_vm3, %v3474_v4, %v1406_v28  ;;  %1229 = vst [vmem:[%s2381_s14 + $0x308] sm:$0xff] %v1165_v37  ;;  %1231 = vst [vmem:[%s2381_s14 + $0x318] sm:$0xff] %v1167_v7  ;;  %v1491_v18 = vmul.f32 0.25, %v1311_v15  ;;  %v1493_v23 = vmul.f32 0.25, %v1314_v11  ;;  %v1523_v55 = vmul.f32 0.75, %v721_v17 }
 0x189   : > { %v1410_v20 = vsel %vm859_vm3, %v3475_v62, %v1409_v44  ;;  %1233 = vst [vmem:[%s2381_s14 + $0x348] sm:$0xff] %v1169_v47  ;;  %1235 = vst [vmem:[%s2381_s14 + $0x358] sm:$0xff] %v1171_v40  ;;  %v1525_v3 = vmul.f32 0.75, %v723_v58  ;;  %v1586_v50 = vmul.f32 0.25, %v1407_v16  ;;  %v1587_v39 = vmul.f32 0.25, %v1463_v35 }
 0x18a   : > { %v1588_v57 = vmul.f32 0.25, %v1410_v20  ;;  %v1589_v59 = vmul.f32 0.25, %v1464_v33  ;;  %v1555_v53 = vadd.f32 %v1523_v55, %v1491_v18  ;;  %v616_v10 = vmul.f32 0.25, %v2920_v21 }
 0x18b   : > { %v1557_v5 = vadd.f32 %v1525_v3, %v1493_v23  ;;  %v646_v34 = vmul.f32 0.75, %v2920_v21  ;;  %v1618_v2 = vadd.f32 %v1586_v50, %v2886_v63  ;;  %v1619_v32 = vadd.f32 %v1587_v39, %v1523_v55 }
 0x18c   : > { %v1620_v17 = vadd.f32 %v1588_v57, %v2889_v24  ;;  %v1621_v58 = vadd.f32 %v1589_v59, %v1525_v3  ;;  %v1674_v41 = vmax.f32 %v1555_v53, 0.0  ;;  %v3027_v61 = vadd.f32 %v3476_v31, %v616_v10 }
 0x18d   : > { %v1678_v25 = vmax.f32 %v1557_v5, 0.0  ;;  %v3030_v49 = vadd.f32 %v646_v34, %v3477_v29  ;;  %v1673_v9 = vmax.f32 %v1618_v2, 0.0  ;;  %v1675_v21 = vmax.f32 %v1619_v32, 0.0  ;;  %v3482_v2 = vld [vmem:[#allocation15_spill] sm:$0xff] }
 0x18e   : > { %v1677_v42 = vmax.f32 %v1620_v17, 0.0  ;;  %v1679_v63 = vmax.f32 %v1621_v58, 0.0  ;;  %1920 = vst [vmem:[%s2381_s14 + $0x2f0] sm:$0xff] %v1674_v41  ;;  %v787_v30 = vrot.slane %v3027_v61, 7  ;;  %v3041_v51 = vmul.f32 0.75, %v3027_v61 }
 0x18f   : > { %1924 = vst [vmem:[%s2381_s14 + $0x330] sm:$0xff] %v1678_v25  ;;  %v1297_v24 = vrot.slane %v3030_v49, 7  ;;  %1919 = vst [vmem:[%s2381_s14 + $0x2e8] sm:$0xff] %v1673_v9  ;;  %v3044_v0 = vmul.f32 0.75, %v3030_v49  ;;  %v561_v12 = vmul.f32 %v3049_v54, %v3478_v8  ;;  %v543_v15 = vmul.f32 %v3049_v54, %v3479_v46 }
 0x190   : > { %1921 = vst [vmem:[%s2381_s14 + $0x2f8] sm:$0xff] %v1675_v21  ;;  %1923 = vst [vmem:[%s2381_s14 + $0x328] sm:$0xff] %v1677_v42  ;;  %v851_v6 = vsel %vm762_vm2, %v3027_v61, %v787_v30  ;;  %v559_v38 = vmul.f32 %v3049_v54, %v3480_v1  ;;  %v546_v52 = vmul.f32 %v3049_v54, %v3481_v19  ;;  %v884_v37 = vrot.slane %v3027_v61, 1 }
 0x191   : > { %1925 = vst [vmem:[%s2381_s14 + $0x338] sm:$0xff] %v1679_v63  ;;  %v1363_v11 = vsel %vm762_vm2, %v3030_v49, %v1297_v24  ;;  %v972_v22 = vmul.f32 0.25, %v851_v6  ;;  %v600_v28 = vadd.f32 %v2914_v13, %v561_v12  ;;  %v582_v44 = vadd.f32 %v2914_v13, %v543_v15 }
 0x192   : > { %v1482_v45 = vmul.f32 0.25, %v1363_v11  ;;  %v598_v7 = vadd.f32 %v2914_v13, %v559_v38  ;;  %v3074_v33 = vadd.f32 %v2914_v13, %v546_v52  ;;  %v1393_v23 = vrot.slane %v3030_v49, 1 }
 0x193   : > { %v1036_v47 = vadd.f32 %v3041_v51, %v972_v22  ;;  %v662_v4 = vmul.f32 0.75, %v600_v28  ;;  %v696_v16 = vmul.f32 0.25, %v600_v28  ;;  %v614_v62 = vmul.f32 0.25, %v582_v44 }
 0x194   : > { %v1546_v40 = vadd.f32 %v3044_v0, %v1482_v45  ;;  %v644_v20 = vmul.f32 0.75, %v582_v44  ;;  %v660_v35 = vmul.f32 0.75, %v598_v7  ;;  %v3097_v32 = vmul.f32 %v3049_v54, %v3482_v2 }
 0x195   : > { %v1148_v18 = vmax.f32 %v1036_v47, 0.0  ;;  %v3077_v3 = vadd.f32 %v696_v16, %v662_v4  ;;  %v3082_v39 = vadd.f32 %v646_v34, %v614_v62  ;;  %v3085_v57 = vadd.f32 %v2747_v48, %v614_v62 }
 0x196   : > { %v1656_v55 = vmax.f32 %v1546_v40, 0.0  ;;  %v3080_v50 = vadd.f32 %v644_v20, %v2744_v43  ;;  %v3087_v59 = vadd.f32 %v644_v20, %v616_v10  ;;  %v3093_v5 = vadd.f32 %v660_v35, %v2779_v27  ;;  %v3483_v43 = vld [vmem:[#allocation16_spill] sm:$0xff] }
 0x197   : > { %1212 = vst [vmem:[%s2381_s14 + $0x200] sm:$0xff] %v1148_v18  ;;  %v1321_v53 = vrot.slane %v3077_v3, 7  ;;  %v3101_v34 = vmul.f32 %v3049_v54, %v3483_v43  ;;  %v784_v10 = vrot.slane %v3082_v39, 7  ;;  %v630_v17 = vmul.f32 0.25, %v598_v7 }
 0x198   : > { %1902 = vst [vmem:[%s2381_s14 + $0x1e0] sm:$0xff] %v1656_v55  ;;  %v781_v48 = vrot.slane %v3080_v50, 7  ;;  %v3106_v58 = vmul.f32 0.25, %v3074_v33  ;;  %v3113_v41 = vmul.f32 0.75, %v3077_v3  ;;  %v3116_v25 = vmul.f32 0.75, %v3080_v50 }
 0x199   : > { %v1371_v27 = vsel %vm762_vm2, %v3077_v3, %v1321_v53  ;;  %v1291_v31 = vrot.slane %v3085_v57, 7  ;;  %v850_v21 = vsel %vm762_vm2, %v3082_v39, %v784_v10  ;;  %v1294_v42 = vrot.slane %v3087_v59, 7 }
 0x19a   : > { %v1498_v29 = vmul.f32 0.25, %v1371_v27  ;;  %v849_v9 = vsel %vm762_vm2, %v3080_v50, %v781_v48  ;;  %v970_v8 = vmul.f32 0.25, %v850_v21  ;;  %v3129_v12 = vmul.f32 0.75, %v3082_v39 }
 0x19b   : > { %v968_v63 = vmul.f32 0.25, %v849_v9  ;;  %v1361_v46 = vsel %vm762_vm2, %v3085_v57, %v1291_v31  ;;  %v1417_v15 = vrot.slane %v3077_v3, 1  ;;  %v1362_v11 = vsel %vm762_vm2, %v3087_v59, %v1294_v42 }
 0x19c   : > { %v1562_v6 = vadd.f32 %v3113_v41, %v1498_v29  ;;  %v1478_v1 = vmul.f32 0.25, %v1361_v46  ;;  %v1034_v19 = vadd.f32 %v3129_v12, %v970_v8  ;;  %v1480_v52 = vmul.f32 0.25, %v1362_v11 }
 0x19d   : > { %v1032_v38 = vadd.f32 %v3116_v25, %v968_v63  ;;  %v3144_v22 = vmul.f32 0.75, %v3085_v57  ;;  %v3147_v28 = vmul.f32 0.75, %v3087_v59  ;;  %v3149_v44 = vadd.f32 %v662_v4, %v630_v17 }
 0x19e   : > { %v1688_v45 = vmax.f32 %v1562_v6, 0.0  ;;  %v3152_v7 = vadd.f32 %v2781_v14, %v630_v17  ;;  %v1144_v40 = vmax.f32 %v1034_v19, 0.0  ;;  %v3155_v20 = vadd.f32 %v696_v16, %v660_v35 }
 0x19f   : > { %v1140_v47 = vmax.f32 %v1032_v38, 0.0  ;;  %v1542_v62 = vadd.f32 %v3144_v22, %v1478_v1  ;;  %v878_v18 = vrot.slane %v3080_v50, 1  ;;  %v1544_v55 = vadd.f32 %v3147_v28, %v1480_v52 }
 0x1a0   : > { %1934 = vst [vmem:[%s2381_s14 + $0x3e0] sm:$0xff] %v1688_v45  ;;  %v3431_v2 = vrot.slane %v3093_v5, 7  ;;  %v3430_v4 = vrot.slane %v3149_v44, 7  ;;  %v881_v43 = vrot.slane %v3082_v39, 1  ;;  %1208 = vst [vmem:[%s2381_s14 + $0x1c0] sm:$0xff] %v1144_v40  ;;  %v3167_v16 = vmul.f32 0.75, %v3093_v5 }
 0x1a1   : > { %1204 = vst [vmem:[%s2381_s14 + $0x180] sm:$0xff] %v1140_v47  ;;  %v1648_v17 = vmax.f32 %v1542_v62, 0.0  ;;  %v1652_v35 = vmax.f32 %v1544_v55, 0.0  ;;  %v3429_v9 = vrot.slane %v3152_v7, 7  ;;  %v3180_v8 = vmul.f32 0.75, %v3149_v44  ;;  %v3484_v55 = vld [vmem:[#allocation8_spill] sm:$0xff] }
 0x1a2   : > { %v857_v27 = vsel %vm762_vm2, %v3093_v5, %v3431_v2  ;;  %v858_v29 = vsel %vm762_vm2, %v3149_v44, %v3430_v4  ;;  %v3428_v46 = vrot.slane %v3155_v20, 7  ;;  %v3190_v1 = vmul.f32 0.75, %v3152_v7 }
 0x1a3   : > { %1894 = vst [vmem:[%s2381_s14 + $0x160] sm:$0xff] %v1648_v17  ;;  %v984_v21 = vmul.f32 0.25, %v857_v27  ;;  %v986_v63 = vmul.f32 0.25, %v858_v29  ;;  %1898 = vst [vmem:[%s2381_s14 + $0x1a0] sm:$0xff] %v1652_v35  ;;  %v1369_v11 = vsel %vm762_vm2, %v3152_v7, %v3429_v9  ;;  %v3193_v38 = vmul.f32 0.75, %v3155_v20 }
 0x1a4   : > { %v1370_v45 = vsel %vm762_vm2, %v3155_v20, %v3428_v46  ;;  %v1494_v47 = vmul.f32 0.25, %v1369_v11  ;;  %v3202_v62 = vmul.f32 0.75, %v3074_v33  ;;  %v681_v17 = vadd.f32 %v3484_v55, %v3106_v58 }
 0x1a5   : > { %v1048_v19 = vadd.f32 %v3167_v16, %v984_v21  ;;  %v1050_v52 = vadd.f32 %v3180_v8, %v986_v63  ;;  %v1496_v40 = vmul.f32 0.25, %v1370_v45  ;;  %v601_v35 = vadd.f32 %v2914_v13, %v3097_v32  ;;  %v3485_v45 = vld [vmem:[#allocation7_spill] sm:$0xff] }
 0x1a6   : > { %v1558_v21 = vadd.f32 %v3190_v1, %v1494_v47  ;;  %v583_v63 = vadd.f32 %v2914_v13, %v3101_v34  ;;  %v713_v33 = vadd.f32 %v3202_v62, %v3485_v45  ;;  %v788_v46 = vrot.slane %v681_v17, 7 }
 0x1a7   : > { %v1172_v27 = vmax.f32 %v1048_v19, 0.0  ;;  %v1176_v29 = vmax.f32 %v1050_v52, 0.0  ;;  %v1560_v11 = vadd.f32 %v3193_v38, %v1496_v40  ;;  %v885_v9 = vrot.slane %v681_v17, 1 }
 0x1a8   : > { %v1680_v55 = vmax.f32 %v1558_v21, 0.0  ;;  %v1005_v32 = vmul.f32 0.75, %v681_v17  ;;  %v3216_v19 = vmul.f32 0.75, %v601_v35  ;;  %v3218_v52 = vmul.f32 0.25, %v601_v35 }
 0x1a9   : > { %1236 = vst [vmem:[%s2381_s14 + $0x380] sm:$0xff] %v1172_v27  ;;  %1240 = vst [vmem:[%s2381_s14 + $0x3c0] sm:$0xff] %v1176_v29  ;;  %v1684_v47 = vmax.f32 %v1560_v11, 0.0  ;;  %v789_v34 = vsel %vm762_vm2, %v787_v30, %v788_v46  ;;  %v886_v40 = vsel %vm859_vm3, %v884_v37, %v885_v9  ;;  %v948_v45 = vsel %vm859_vm3, %v885_v9, %v681_v17 }
 0x1aa   : > { %1926 = vst [vmem:[%s2381_s14 + $0x360] sm:$0xff] %v1680_v55  ;;  %v973_v27 = vmul.f32 0.25, %v789_v34  ;;  %v1068_v29 = vmul.f32 0.25, %v886_v40  ;;  %v1069_v21 = vmul.f32 0.25, %v948_v45  ;;  %v1298_v4 = vrot.slane %v713_v33, 7 }
 0x1ab   : > { %1930 = vst [vmem:[%s2381_s14 + $0x3a0] sm:$0xff] %v1684_v47  ;;  %v1394_v2 = vrot.slane %v713_v33, 1  ;;  %v1515_v35 = vmul.f32 0.75, %v713_v33  ;;  %v729_v11 = vadd.f32 %v3218_v52, %v3216_v19  ;;  %v615_v6 = vmul.f32 0.25, %v583_v63 }
 0x1ac   : > { %v1037_v14 = vadd.f32 %v1005_v32, %v973_v27  ;;  %v1100_v61 = vadd.f32 %v1068_v29, %v3041_v51  ;;  %v1101_v30 = vadd.f32 %v1069_v21, %v1005_v32  ;;  %v1299_v37 = vsel %vm762_vm2, %v1297_v24, %v1298_v4 }
 0x1ad   : > { %v1395_v9 = vsel %vm859_vm3, %v1393_v23, %v1394_v2  ;;  %v1459_v46 = vsel %vm859_vm3, %v1394_v2, %v713_v33  ;;  %v1483_v17 = vmul.f32 0.25, %v1299_v37  ;;  %v1322_v55 = vrot.slane %v729_v11, 7 }
 0x1ae   : > { %v1149_v47 = vmax.f32 %v1100_v61, 0.0  ;;  %v1150_v34 = vmax.f32 %v1037_v14, 0.0  ;;  %v1151_v40 = vmax.f32 %v1101_v30, 0.0  ;;  %v1578_v45 = vmul.f32 0.25, %v1395_v9 }
 0x1af   : > { %v1547_v51 = vadd.f32 %v1515_v35, %v1483_v17  ;;  %v1579_v27 = vmul.f32 0.25, %v1459_v46  ;;  %v1323_v32 = vsel %vm762_vm2, %v1321_v53, %v1322_v55  ;;  %v1418_v29 = vrot.slane %v729_v11, 1 }
 0x1b0   : > { %1213 = vst [vmem:[%s2381_s14 + $0x208] sm:$0xff] %v1149_v47  ;;  %1214 = vst [vmem:[%s2381_s14 + $0x210] sm:$0xff] %v1150_v34  ;;  %v1610_v49 = vadd.f32 %v1578_v45, %v3044_v0  ;;  %v1499_v24 = vmul.f32 0.25, %v1323_v32  ;;  %v1531_v23 = vmul.f32 0.75, %v729_v11  ;;  %v645_v2 = vmul.f32 0.75, %v583_v63 }
 0x1b1   : > { %1215 = vst [vmem:[%s2381_s14 + $0x218] sm:$0xff] %v1151_v40  ;;  %v1611_v4 = vadd.f32 %v1579_v27, %v1515_v35  ;;  %v1658_v14 = vmax.f32 %v1547_v51, 0.0  ;;  %v1419_v33 = vsel %vm859_vm3, %v1417_v15, %v1418_v29  ;;  %v1467_v53 = vsel %vm859_vm3, %v1418_v29, %v729_v11 }
 0x1b2   : > { %v1657_v21 = vmax.f32 %v1610_v49, 0.0  ;;  %v1563_v61 = vadd.f32 %v1531_v23, %v1499_v24  ;;  %v1594_v30 = vmul.f32 0.25, %v1419_v33  ;;  %v1595_v37 = vmul.f32 0.25, %v1467_v53 }
 0x1b3   : > { %v1659_v9 = vmax.f32 %v1611_v4, 0.0  ;;  %1904 = vst [vmem:[%s2381_s14 + $0x1f0] sm:$0xff] %v1658_v14  ;;  %v677_v0 = vadd.f32 %v645_v2, %v2803_v36  ;;  %v679_v63 = vadd.f32 %v3202_v62, %v615_v6  ;;  %v709_v35 = vadd.f32 %v2805_v60, %v615_v6 }
 0x1b4   : > { %1903 = vst [vmem:[%s2381_s14 + $0x1e8] sm:$0xff] %v1657_v21  ;;  %v1626_v3 = vadd.f32 %v1594_v30, %v3113_v41  ;;  %v1627_v15 = vadd.f32 %v1595_v37, %v1531_v23  ;;  %v1690_v46 = vmax.f32 %v1563_v61, 0.0  ;;  %v711_v11 = vadd.f32 %v645_v2, %v3106_v58 }
 0x1b5   : > { %1905 = vst [vmem:[%s2381_s14 + $0x1f8] sm:$0xff] %v1659_v9  ;;  %v782_v17 = vrot.slane %v677_v0, 7  ;;  %v785_v55 = vrot.slane %v679_v63, 7  ;;  %v879_v47 = vrot.slane %v677_v0, 1  ;;  %v882_v34 = vrot.slane %v679_v63, 1 }
 0x1b6   : > { %v1689_v40 = vmax.f32 %v1626_v3, 0.0  ;;  %v1691_v36 = vmax.f32 %v1627_v15, 0.0  ;;  %1936 = vst [vmem:[%s2381_s14 + $0x3f0] sm:$0xff] %v1690_v46  ;;  %v1001_v62 = vmul.f32 0.75, %v677_v0  ;;  %v1003_v45 = vmul.f32 0.75, %v679_v63  ;;  %v3486_v46 = vld [vmem:[#allocation17_spill] sm:$0xff] }
 0x1b7   : > { %v783_v60 = vsel %vm762_vm2, %v781_v48, %v782_v17  ;;  %v786_v41 = vsel %vm762_vm2, %v784_v10, %v785_v55  ;;  %v880_v58 = vsel %vm859_vm3, %v878_v18, %v879_v47  ;;  %v883_v6 = vsel %vm859_vm3, %v881_v43, %v882_v34 }
 0x1b8   : > { %1935 = vst [vmem:[%s2381_s14 + $0x3e8] sm:$0xff] %v1689_v40  ;;  %1937 = vst [vmem:[%s2381_s14 + $0x3f8] sm:$0xff] %v1691_v36  ;;  %v946_v51 = vsel %vm859_vm3, %v879_v47, %v677_v0  ;;  %v947_v27 = vsel %vm859_vm3, %v882_v34, %v679_v63  ;;  %v969_v32 = vmul.f32 0.25, %v783_v60  ;;  %v971_v48 = vmul.f32 0.25, %v786_v41 }
 0x1b9   : > { %v1064_v29 = vmul.f32 0.25, %v880_v58  ;;  %v1065_v49 = vmul.f32 0.25, %v946_v51  ;;  %v1066_v24 = vmul.f32 0.25, %v883_v6  ;;  %v1067_v10 = vmul.f32 0.25, %v947_v27 }
 0x1ba   : > { %v1033_v23 = vadd.f32 %v1001_v62, %v969_v32  ;;  %v1035_v50 = vadd.f32 %v1003_v45, %v971_v48  ;;  %v1292_v18 = vrot.slane %v709_v35, 7  ;;  %v1295_v39 = vrot.slane %v711_v11, 7 }
 0x1bb   : > { %v1096_v43 = vadd.f32 %v1064_v29, %v3116_v25  ;;  %v1097_v2 = vadd.f32 %v1065_v49, %v1001_v62  ;;  %v1098_v4 = vadd.f32 %v1066_v24, %v3129_v12  ;;  %v1099_v14 = vadd.f32 %v1067_v10, %v1003_v45 }
 0x1bc   : > { %v1142_v33 = vmax.f32 %v1033_v23, 0.0  ;;  %v1146_v53 = vmax.f32 %v1035_v50, 0.0  ;;  %v1293_v21 = vsel %vm762_vm2, %v1291_v31, %v1292_v18  ;;  %v1296_v61 = vsel %vm762_vm2, %v1294_v42, %v1295_v39 }
 0x1bd   : > { %v1141_v30 = vmax.f32 %v1096_v43, 0.0  ;;  %v1143_v25 = vmax.f32 %v1097_v2, 0.0  ;;  %v1145_v37 = vmax.f32 %v1098_v4, 0.0  ;;  %v1147_v9 = vmax.f32 %v1099_v14, 0.0 }
 0x1be   : > { %1206 = vst [vmem:[%s2381_s14 + $0x190] sm:$0xff] %v1142_v33  ;;  %1210 = vst [vmem:[%s2381_s14 + $0x1d0] sm:$0xff] %v1146_v53  ;;  %v1388_v12 = vrot.slane %v709_v35, 1  ;;  %v1391_v0 = vrot.slane %v711_v11, 1  ;;  %v1479_v63 = vmul.f32 0.25, %v1293_v21  ;;  %v1481_v3 = vmul.f32 0.25, %v1296_v61 }
 0x1bf   : > { %1205 = vst [vmem:[%s2381_s14 + $0x188] sm:$0xff] %v1141_v30  ;;  %1207 = vst [vmem:[%s2381_s14 + $0x198] sm:$0xff] %v1143_v25  ;;  %v1511_v15 = vmul.f32 0.75, %v709_v35  ;;  %v1513_v31 = vmul.f32 0.75, %v711_v11  ;;  %v560_v17 = vmul.f32 %v3049_v54, %v3486_v46  ;;  %v3487_v42 = vrot.slane %v3085_v57, 1 }
 0x1c0   : > { %1209 = vst [vmem:[%s2381_s14 + $0x1c8] sm:$0xff] %v1145_v37  ;;  %1211 = vst [vmem:[%s2381_s14 + $0x1d8] sm:$0xff] %v1147_v9  ;;  %v3488_v47 = vrot.slane %v3087_v59, 1  ;;  %v1457_v40 = vsel %vm859_vm3, %v1388_v12, %v709_v35  ;;  %v1458_v36 = vsel %vm859_vm3, %v1391_v0, %v711_v11  ;;  %v902_v29 = vrot.slane %v3093_v5, 1 }
 0x1c1   : > { %v1389_v55 = vsel %vm859_vm3, %v3487_v42, %v1388_v12  ;;  %v1543_v62 = vadd.f32 %v1511_v15, %v1479_v63  ;;  %v1545_v45 = vadd.f32 %v1513_v31, %v1481_v3  ;;  %v1575_v41 = vmul.f32 0.25, %v1457_v40 }
 0x1c2   : > { %v1392_v34 = vsel %vm859_vm3, %v3488_v47, %v1391_v0  ;;  %v1574_v60 = vmul.f32 0.25, %v1389_v55  ;;  %v1577_v54 = vmul.f32 0.25, %v1458_v36  ;;  %v599_v57 = vadd.f32 %v2914_v13, %v560_v17 }
 0x1c3   : > { %v1576_v58 = vmul.f32 0.25, %v1392_v34  ;;  %v1607_v51 = vadd.f32 %v1575_v41, %v1511_v15  ;;  %v1650_v59 = vmax.f32 %v1543_v62, 0.0  ;;  %v1654_v27 = vmax.f32 %v1545_v45, 0.0 }
 0x1c4   : > { %v1606_v6 = vadd.f32 %v1574_v60, %v3144_v22  ;;  %v1609_v35 = vadd.f32 %v1577_v54, %v1513_v31  ;;  %v631_v11 = vmul.f32 0.25, %v599_v57  ;;  %v661_v48 = vmul.f32 0.75, %v599_v57 }
 0x1c5   : > { %v1608_v32 = vadd.f32 %v1576_v58, %v3147_v28  ;;  %v905_v49 = vrot.slane %v3149_v44, 1  ;;  %v1651_v13 = vmax.f32 %v1607_v51, 0.0  ;;  %1896 = vst [vmem:[%s2381_s14 + $0x170] sm:$0xff] %v1650_v59  ;;  %1900 = vst [vmem:[%s2381_s14 + $0x1b0] sm:$0xff] %v1654_v27  ;;  %v1411_v50 = vrot.slane %v3152_v7, 1 }
 0x1c6   : > { %v1649_v24 = vmax.f32 %v1606_v6, 0.0  ;;  %v1655_v10 = vmax.f32 %v1609_v35, 0.0  ;;  %v693_v23 = vadd.f32 %v661_v48, %v2902_v56  ;;  %v695_v28 = vadd.f32 %v3216_v19, %v631_v11 }
 0x1c7   : > { %v1653_v22 = vmax.f32 %v1608_v32, 0.0  ;;  %v1414_v18 = vrot.slane %v3155_v20, 1  ;;  %1897 = vst [vmem:[%s2381_s14 + $0x178] sm:$0xff] %v1651_v13  ;;  %v725_v39 = vadd.f32 %v2905_v26, %v631_v11  ;;  %v727_v43 = vadd.f32 %v3218_v52, %v661_v48 }
 0x1c8   : > { %1895 = vst [vmem:[%s2381_s14 + $0x168] sm:$0xff] %v1649_v24  ;;  %1901 = vst [vmem:[%s2381_s14 + $0x1b8] sm:$0xff] %v1655_v10  ;;  %v806_v2 = vrot.slane %v693_v23, 7  ;;  %v809_v4 = vrot.slane %v695_v28, 7  ;;  %v903_v14 = vrot.slane %v693_v23, 1  ;;  %v906_v33 = vrot.slane %v695_v28, 1 }
 0x1c9   : > { %1899 = vst [vmem:[%s2381_s14 + $0x1a8] sm:$0xff] %v1653_v22  ;;  %v1017_v53 = vmul.f32 0.75, %v693_v23  ;;  %v1019_v56 = vmul.f32 0.75, %v695_v28  ;;  %v1316_v21 = vrot.slane %v725_v39, 7  ;;  %v1319_v19 = vrot.slane %v727_v43, 7 }
 0x1ca   : > { %v3489_v61 = vrot.slane %v3093_v5, 7  ;;  %v3490_v25 = vrot.slane %v3149_v44, 7  ;;  %v904_v52 = vsel %vm859_vm3, %v902_v29, %v903_v14  ;;  %v907_v37 = vsel %vm859_vm3, %v905_v49, %v906_v33 }
 0x1cb   : > { %v954_v9 = vsel %vm859_vm3, %v903_v14, %v693_v23  ;;  %v955_v12 = vsel %vm859_vm3, %v906_v33, %v695_v28  ;;  %v1080_v3 = vmul.f32 0.25, %v904_v52  ;;  %v1082_v31 = vmul.f32 0.25, %v907_v37 }
 0x1cc   : > { %v807_v30 = vsel %vm762_vm2, %v3489_v61, %v806_v2  ;;  %v810_v26 = vsel %vm762_vm2, %v3490_v25, %v809_v4  ;;  %v1081_v15 = vmul.f32 0.25, %v954_v9  ;;  %v1083_v5 = vmul.f32 0.25, %v955_v12 }
 0x1cd   : > { %v985_v0 = vmul.f32 0.25, %v807_v30  ;;  %v987_v63 = vmul.f32 0.25, %v810_v26  ;;  %v3491_v44 = vrot.slane %v3152_v7, 7  ;;  %v3492_v55 = vrot.slane %v3155_v20, 7 }
 0x1ce   : > { %v1112_v34 = vadd.f32 %v1080_v3, %v3167_v16  ;;  %v1113_v40 = vadd.f32 %v1081_v15, %v1017_v53  ;;  %v1114_v36 = vadd.f32 %v1082_v31, %v3180_v8  ;;  %v1115_v62 = vadd.f32 %v1083_v5, %v1019_v56 }
 0x1cf   : > { %v1049_v46 = vadd.f32 %v1017_v53, %v985_v0  ;;  %v1051_v17 = vadd.f32 %v1019_v56, %v987_v63  ;;  %v1317_v42 = vsel %vm762_vm2, %v3491_v44, %v1316_v21  ;;  %v1320_v47 = vsel %vm762_vm2, %v3492_v55, %v1319_v19 }
 0x1d0   : > { %v1412_v7 = vrot.slane %v725_v39, 1  ;;  %v1415_v41 = vrot.slane %v727_v43, 1  ;;  %v1173_v58 = vmax.f32 %v1112_v34, 0.0  ;;  %v1175_v54 = vmax.f32 %v1113_v40, 0.0 }
 0x1d1   : > { %v1174_v45 = vmax.f32 %v1049_v46, 0.0  ;;  %v1178_v60 = vmax.f32 %v1051_v17, 0.0  ;;  %v1177_v57 = vmax.f32 %v1114_v36, 0.0  ;;  %v1179_v20 = vmax.f32 %v1115_v62, 0.0 }
 0x1d2   : > { %v1413_v16 = vsel %vm859_vm3, %v1411_v50, %v1412_v7  ;;  %v1416_v8 = vsel %vm859_vm3, %v1414_v18, %v1415_v41  ;;  %v1465_v6 = vsel %vm859_vm3, %v1412_v7, %v725_v39  ;;  %v1466_v51 = vsel %vm859_vm3, %v1415_v41, %v727_v43  ;;  %1237 = vst [vmem:[%s2381_s14 + $0x388] sm:$0xff] %v1173_v58 }
 0x1d3   : > { %1238 = vst [vmem:[%s2381_s14 + $0x390] sm:$0xff] %v1174_v45  ;;  %1242 = vst [vmem:[%s2381_s14 + $0x3d0] sm:$0xff] %v1178_v60  ;;  %v1495_v59 = vmul.f32 0.25, %v1317_v42  ;;  %v1497_v27 = vmul.f32 0.25, %v1320_v47  ;;  %v1527_v32 = vmul.f32 0.75, %v725_v39  ;;  %v1529_v35 = vmul.f32 0.75, %v727_v43 }
 0x1d4   : > { %1239 = vst [vmem:[%s2381_s14 + $0x398] sm:$0xff] %v1175_v54  ;;  %1241 = vst [vmem:[%s2381_s14 + $0x3c8] sm:$0xff] %v1177_v57  ;;  %v1590_v11 = vmul.f32 0.25, %v1413_v16  ;;  %v1591_v48 = vmul.f32 0.25, %v1465_v6  ;;  %v1592_v29 = vmul.f32 0.25, %v1416_v8  ;;  %v1593_v49 = vmul.f32 0.25, %v1466_v51 }
 0x1d5   : > { %1243 = vst [vmem:[%s2381_s14 + $0x3d8] sm:$0xff] %v1179_v20  ;;  %v1559_v24 = vadd.f32 %v1527_v32, %v1495_v59  ;;  %v1561_v13 = vadd.f32 %v1529_v35, %v1497_v27 }
 0x1d6   : > { %v1622_v22 = vadd.f32 %v1590_v11, %v3190_v1  ;;  %v1623_v10 = vadd.f32 %v1591_v48, %v1527_v32  ;;  %v1624_v23 = vadd.f32 %v1592_v29, %v3193_v38  ;;  %v1625_v28 = vadd.f32 %v1593_v49, %v1529_v35 }
 0x1d7   : > { %v1682_v50 = vmax.f32 %v1559_v24, 0.0  ;;  %v1686_v18 = vmax.f32 %v1561_v13, 0.0 }
 0x1d8   : > { %v1681_v1 = vmax.f32 %v1622_v22, 0.0  ;;  %v1683_v39 = vmax.f32 %v1623_v10, 0.0  ;;  %v1685_v43 = vmax.f32 %v1624_v23, 0.0  ;;  %v1687_v2 = vmax.f32 %v1625_v28, 0.0 }
 0x1d9   : > { %1928 = vst [vmem:[%s2381_s14 + $0x370] sm:$0xff] %v1682_v50  ;;  %1932 = vst [vmem:[%s2381_s14 + $0x3b0] sm:$0xff] %v1686_v18 }
 0x1da   : > { %1927 = vst [vmem:[%s2381_s14 + $0x368] sm:$0xff] %v1681_v1  ;;  %1929 = vst [vmem:[%s2381_s14 + $0x378] sm:$0xff] %v1683_v39 }
 0x1db   : > { %1931 = vst [vmem:[%s2381_s14 + $0x3a8] sm:$0xff] %v1685_v43  ;;  %1933 = vst [vmem:[%s2381_s14 + $0x3b8] sm:$0xff] %v1687_v2 }
 0x1dc   : > { %2072 = shalt.err (!%p2069_p3)
}
 0x1dd   : > { %s2073_s11 = scalar_lea.hbm %s3351_s5, 16384  ;;  %s2077_s14 = scalar_lea.hbm %s3408_s4, 32768 }
 0x1de   : > { %p2074_p4 = scmp.ne.s32.totalorder %s3351_s5, %s2073_s11  ;;  %p2078_p9 = scmp.lt.u32.totalorder %s3351_s5, %s3408_s4 }
 0x1df   : > { %p2079_p10 = scmp.lt.u32.totalorder %s2077_s14, %s2073_s11  ;;  %p2081_p12 = scmp.lt.u32.totalorder %s2073_s11, %s3351_s5 }
 0x1e0   : > { %p2075_p7 = pnand %p2074_p4, %p2189_p5 }
 0x1e1   : > { %p2080_p11 = por %p2079_p10, %p2078_p9 }
 0x1e2   : > { %p2076_p8 = pneg %p2075_p7 }
 0x1e3   : > { %p2082_p13 = por %p2081_p12, %p2080_p11 }
 0x1e5   : > { %p2083_p0 = pnand %p2082_p13, %p2076_p8 }
 0x1e7   : > { %2086 = shalt.err (!%p2083_p0)
}
 0x1e8   : > { %s2124_s23 = smov 256   ;;  %s2125_s27 = smov 16  }
 0x1e9   : > { %2000 = dma.vmem_to_hbm [thread:$0]  (%p2189_p5), %s3353_s29, 16384, %s3351_s5, %s3363_s6, %s2124_s23, %s2124_s23, %s2125_s27  }
 0x1ea PF: > { %p2006_p1 = scmp.ge.s32.totalorder %s2121_s18, 2  ;;  %s1786_s28 = sand.u32 1, %s2109_s15  }
 0x1eb   : > { %s1787_s30 = scalar_lea.sflag [#allocation3], %s1786_s28 }
 0x1ec   : > { %p2003_p2 = pnand %p2006_p1, %p2193_p6 }
 0x1ee   : > { %2104 = dma.done.wait (!%p2003_p2), %s1787_s30, 16384  }
 0x1ef   : > { %2106 = vsyncadd (!%p2003_p2), %s1787_s30, 4294950912  ;;  %p14_p3 = scmp.ge.s32.totalorder %s2176_s21, 4   ;;  %s3493_s15 = smov %s2113_s16 }
 0x1f0   : > { %s3494_s16 = smov %s2117_s17  ;;  %s3495_s17 = smov %s2187_s24 }
 0x1f1   : > { %s3496_s18 = smov %s2176_s21  ;;  %16 = sbr.rel (!%p14_p3) target bundleno = 3 (0x3), region = 72 }
 0x1f8   :  { %1792 = vsyncpa [#allocation3], 1 }
 0x1f9   :  { %1794 = vsyncpa [#allocation3 + $0x1], 1 }

</bundles_post_ra>
